<compile_context>
chip_gen: v7x
topology: tpu7x:2x2x1
jax: 0.10.0
libtpu: 0.0.40
codegen_flags: <defaults>
</compile_context>

<pallas_src>
import functools

import jax
import jax.numpy as jnp
import numpy as np
from jax.experimental import pallas as pl
from jax.experimental.pallas import tpu as pltpu


# ---------------------------------------------------------------------------
# Kernel 1: fused 1x1-down + dilated depthwise branches + avg-pool + progressive
# adds + grouped attention gate + block-diagonal grouped 1x1 fuse, plus per-image
# BN partial stats.  One batch element per grid step, layout (C, H*W).
# ---------------------------------------------------------------------------
def _dpcb_fused_kernel(x_ref, wd_ref, wdw_ref, watt_ref, wblk_ref, mask_ref,
                       z_ref, sum_ref, sq_ref, ypad_ref, cat_ref, *,
                       H, W, inter, dils, pad, off_row):
    HW = H * W
    maxd = max(dils)
    pv = maxd * W                 # vertical-reach margin kept in every pre-shifted buffer
    L = HW + 2 * pv

    # ---- 1x1 channel-reduction conv on the MXU: (inter, Cin) @ (Cin, HW) ----
    y = jnp.dot(wd_ref[...], x_ref[0], preferred_element_type=jnp.float32)

    # ---- persistent zero-padded flat buffer (VMEM scratch: no concatenate copy) ----
    # Pads are re-zeroed every step (cheap: 2*pad lanes) so the kernel stays correct
    # even if the "parallel" batch axis is split across TensorCores.
    ypad_ref[:, 0:pad] = jnp.zeros((inter, pad), jnp.float32)
    ypad_ref[:, pad + HW:pad + HW + pad] = jnp.zeros((inter, pad), jnp.float32)
    ypad_ref[:, pad:pad + HW] = y

    # ---- hoist horizontal shift + W-wrap mask out of the 45-tap loops ----
    # Build the 9 distinct column-offset views once; every tap below is a static
    # row-offset (multiple of W) slice of one of these buffers.
    masks = mask_ref[...]                                   # (8, L) float {0,1}
    yh = {}
    for h in sorted({j * d for d in dils for j in (-1, 0, 1)}):
        start = pad - pv + h
        buf = ypad_ref[:, start:start + L]
        if h != 0:
            k = off_row[h]
            buf = buf * masks[k:k + 1, :]
        yh[h] = buf

    def tap(d, i, j):
        v = pv + i * d * W
        return yh[j * d][:, v:v + HW]

    wdw = wdw_ref[...]                                      # (inter, 36) depthwise weights
    watt = watt_ref[...]                                    # (4, inter) attention weights

    # ---- 3x3 avg pool, stride 1, pad 1 (count_include_pad=True -> /9). ----
    # The nine d=1 taps are shared with branch 1 below.
    t1 = {(i, j): tap(1, i, j) for i in (-1, 0, 1) for j in (-1, 0, 1)}
    p = None
    for t in t1.values():
        p = t if p is None else p + t
    prev = p * (1.0 / 9.0)

    # ---- dilated depthwise branches + progressive adds, with the attention gate ----
    # interleaved per group (no un-gated d_g list stays live past its group).
    for g, d in enumerate(dils):
        acc = None
        for i in (-1, 0, 1):
            for j in (-1, 0, 1):
                c = g * 9 + (i + 1) * 3 + (j + 1)
                t = t1[(i, j)] if d == 1 else tap(d, i, j)
                term = t * wdw[:, c:c + 1]
                acc = term if acc is None else acc + term
        cur = prev + acc                                    # d_g
        # grouped 1x1 attention gate on the MXU; row g is this group's gate map
        a = jnp.dot(watt, cur, preferred_element_type=jnp.float32)[g:g + 1, :]
        cat_ref[g * inter:(g + 1) * inter, :] = cur * (1.0 + jax.nn.sigmoid(a))
        prev = cur

    # ---- grouped 1x1 fuse as ONE block-diagonal MXU matmul + one full-tile store ----
    z = jnp.dot(wblk_ref[...], cat_ref[...], preferred_element_type=jnp.float32)
    z_ref[0] = z
    # per-image BN partial stats (tiny cross-batch reduction happens in the wrapper)
    sum_ref[0] = jnp.sum(z, axis=1, keepdims=True)
    sq_ref[0] = jnp.sum(z * z, axis=1, keepdims=True)


# ---------------------------------------------------------------------------
# Kernel 2: fused BatchNorm (precomputed per-channel scale/shift) + PReLU, in place.
# Tiled independently of N on a flattened (N*C, HW) view with lane-dense blocks.
# ---------------------------------------------------------------------------
def _bn_prelu_kernel(z_ref, scale_ref, shift_ref, alpha_ref, o_ref):
    t = z_ref[...] * scale_ref[...] + shift_ref[...]
    o_ref[...] = jnp.where(t >= 0.0, t, alpha_ref[...] * t)


def _pick_block(full, unit, cap):
    """Largest multiple of `unit` that divides `full` and is <= cap (else `full`)."""
    if full % unit != 0:
        return full
    best = unit
    b = unit
    limit = min(cap, full)
    while b <= limit:
        if full % b == 0:
            best = b
        b += unit
    return best


# ---------------------------------------------------------------------------
# Wrapper
# ---------------------------------------------------------------------------
def dilated_parallel_conv_block(x, params):
    (w_down, w_dw1, w_dw2, w_dw3, w_dw4, w_att, w_fuse, gamma, beta, prelu_a) = params
    N, Cin, H, W = x.shape
    inter = w_down.shape[0]
    out_planes = 4 * inter
    HW = H * W
    dils = (1, 2, 4, 8)
    eps = 1e-5
    maxd = max(dils)
    pv = maxd * W
    # left/right flat zero pad, rounded up to 128 lanes (lane-aligned centre store)
    pad = ((maxd * (W + 1) + 127) // 128) * 128
    # TODO(synk): only stride=1 (the module default) is implemented.

    # ---- layout prep (free reshapes, tiny constants; no transposes of x) ----
    xf = x.reshape(N, Cin, HW)
    wd = w_down.reshape(inter, Cin)                                       # 1x1 down
    wdw = jnp.concatenate([w.reshape(inter, 9)                            # (inter, 36)
                           for w in (w_dw1, w_dw2, w_dw3, w_dw4)], axis=1)
    watt = w_att.reshape(4, inter)
    wf = w_fuse.reshape(out_planes, inter)
    wblk = jnp.zeros((out_planes, out_planes), jnp.float32)               # block-diag fuse
    for g in range(4):
        wblk = wblk.at[g * inter:(g + 1) * inter,
                       g * inter:(g + 1) * inter].set(wf[g * inter:(g + 1) * inter])

    # W row-wrap masks: one row per distinct nonzero column offset, over the extended
    # (pre-shift) length; applied once per offset in-kernel (not per tap).
    offs = sorted({j * d for d in dils for j in (-1, 1)})
    off_row = {o: k for k, o in enumerate(offs)}
    L = HW + 2 * pv
    tcol = np.arange(L) % W
    masks = jnp.asarray(np.stack(
        [((tcol + o >= 0) & (tcol + o < W)).astype(np.float32) for o in offs], axis=0))
    n_off = len(offs)

    kernel1 = functools.partial(_dpcb_fused_kernel, H=H, W=W, inter=inter,
                                dils=dils, pad=pad, off_row=off_row)
    # TODO(synk): for very large H*W add halo-based spatial tiling (manual DMA of a
    # maxdil-row halo window); one image per grid step is sized for small/moderate H*W.
    z, ssum, ssq = pl.pallas_call(
        kernel1,
        out_shape=(jax.ShapeDtypeStruct((N, out_planes, HW), jnp.float32),
                   jax.ShapeDtypeStruct((N, out_planes, 1), jnp.float32),
                   jax.ShapeDtypeStruct((N, out_planes, 1), jnp.float32)),
        grid=(N,),
        in_specs=[pl.BlockSpec((1, Cin, HW), lambda n: (n, 0, 0)),
                  pl.BlockSpec((inter, Cin), lambda n: (0, 0)),
                  pl.BlockSpec((inter, 36), lambda n: (0, 0)),
                  pl.BlockSpec((4, inter), lambda n: (0, 0)),
                  pl.BlockSpec((out_planes, out_planes), lambda n: (0, 0)),
                  pl.BlockSpec((n_off, L), lambda n: (0, 0))],
        out_specs=(pl.BlockSpec((1, out_planes, HW), lambda n: (n, 0, 0)),
                   pl.BlockSpec((1, out_planes, 1), lambda n: (n, 0, 0)),
                   pl.BlockSpec((1, out_planes, 1), lambda n: (n, 0, 0))),
        scratch_shapes=[pltpu.VMEM((inter, HW + 2 * pad), jnp.float32),   # padded y
                        pltpu.VMEM((out_planes, HW), jnp.float32)],       # gated concat
        compiler_params=pltpu.CompilerParams(
            dimension_semantics=("parallel",),
            vmem_limit_bytes=64 * 1024 * 1024),
    )(xf, wd, wdw, watt, wblk, masks)

    # ---- BatchNorm2d statistics (training mode: biased batch stats) ----
    count = N * HW
    mean = jnp.sum(ssum[:, :, 0], axis=0) / count
    var = jnp.sum(ssq[:, :, 0], axis=0) / count - mean * mean
    var = jnp.maximum(var, 0.0)            # guard E[z^2] - mean^2 cancellation
    inv_std = 1.0 / jnp.sqrt(var + eps)
    scale = gamma * inv_std
    shift = beta - mean * scale

    # ---- fused BN + PReLU on a flattened (N*C, HW) view, lane-dense blocks, in-place ----
    rows = N * out_planes
    zf = z.reshape(rows, HW)
    scale_r = jnp.tile(scale.reshape(out_planes, 1), (N, 1))
    shift_r = jnp.tile(shift.reshape(out_planes, 1), (N, 1))
    alpha_r = jnp.tile(prelu_a.reshape(out_planes, 1), (N, 1))
    rb = _pick_block(rows, 8, 256)
    cb = _pick_block(HW, 128, 2048)

    out = pl.pallas_call(
        _bn_prelu_kernel,
        out_shape=jax.ShapeDtypeStruct((rows, HW), jnp.float32),
        grid=(rows // rb, HW // cb),
        in_specs=[pl.BlockSpec((rb, cb), lambda i, j: (i, j)),
                  pl.BlockSpec((rb, 1), lambda i, j: (i, 0)),
                  pl.BlockSpec((rb, 1), lambda i, j: (i, 0)),
                  pl.BlockSpec((rb, 1), lambda i, j: (i, 0))],
        out_specs=pl.BlockSpec((rb, cb), lambda i, j: (i, j)),
        input_output_aliases={0: 0},
        compiler_params=pltpu.CompilerParams(
            dimension_semantics=("parallel", "parallel"),
            vmem_limit_bytes=64 * 1024 * 1024),
    )(zf, scale_r, shift_r, alpha_r)

    return out.reshape(N, out_planes, H, W)


# ---------------------------------------------------------------------------
# Pure-JAX reference (PyTorch semantics) for correctness checking
# ---------------------------------------------------------------------------
def reference(x, params):
    (w_down, w_dw1, w_dw2, w_dw3, w_dw4, w_att, w_fuse, gamma, beta, prelu_a) = params
    inter = w_down.shape[0]

    def conv(v, w, dil, pad, groups):
        return jax.lax.conv_general_dilated(
            v, w, window_strides=(1, 1), padding=[(pad, pad), (pad, pad)],
            rhs_dilation=(dil, dil), feature_group_count=groups,
            dimension_numbers=('NCHW', 'OIHW', 'NCHW'),
            precision=jax.lax.Precision.HIGHEST)

    y = conv(x, w_down, 1, 0, 1)
    c1 = conv(y, w_dw1, 1, 1, inter)
    c2 = conv(y, w_dw2, 2, 2, inter)
    c3 = conv(y, w_dw3, 4, 4, inter)
    c4 = conv(y, w_dw4, 8, 8, inter)
    p = jax.lax.reduce_window(y, 0.0, jax.lax.add, (1, 1, 3, 3), (1, 1, 1, 1),
                              [(0, 0), (0, 0), (1, 1), (1, 1)]) / 9.0
    d1 = c1 + p
    d2 = d1 + c2
    d3 = d2 + c3
    d4 = d3 + c4
    cat = jnp.concatenate([d1, d2, d3, d4], axis=1)
    att = jax.nn.sigmoid(conv(cat, w_att, 1, 0, 4))
    d1 = d1 * (1.0 + att[:, 0:1])
    d2 = d2 * (1.0 + att[:, 1:2])
    d3 = d3 * (1.0 + att[:, 2:3])
    d4 = d4 * (1.0 + att[:, 3:4])
    cat2 = jnp.concatenate([d1, d2, d3, d4], axis=1)
    z = conv(cat2, w_fuse, 1, 0, 4)
    mean = jnp.mean(z, axis=(0, 2, 3), keepdims=True)
    var = jnp.mean((z - mean) ** 2, axis=(0, 2, 3), keepdims=True)
    zn = (z - mean) / jnp.sqrt(var + 1e-5)
    zn = zn * gamma.reshape(1, -1, 1, 1) + beta.reshape(1, -1, 1, 1)
    a = prelu_a.reshape(1, -1, 1, 1)
    return jnp.where(zn >= 0.0, zn, a * zn)


if __name__ == "__main__":
    key = jax.random.PRNGKey(0)
    ks = jax.random.split(key, 11)
    N, Cin, out_planes, H, W = 2, 8, 16, 16, 16
    inter = out_planes // 4

    x = jax.random.normal(ks[0], (N, Cin, H, W), jnp.float32)
    w_down = 0.3 * jax.random.normal(ks[1], (inter, Cin, 1, 1), jnp.float32)
    w_dw1 = 0.3 * jax.random.normal(ks[2], (inter, 1, 3, 3), jnp.float32)
    w_dw2 = 0.3 * jax.random.normal(ks[3], (inter, 1, 3, 3), jnp.float32)
    w_dw3 = 0.3 * jax.random.normal(ks[4], (inter, 1, 3, 3), jnp.float32)
    w_dw4 = 0.3 * jax.random.normal(ks[5], (inter, 1, 3, 3), jnp.float32)
    w_att = 0.3 * jax.random.normal(ks[6], (4, inter, 1, 1), jnp.float32)
    w_fuse = 0.3 * jax.random.normal(ks[7], (out_planes, inter, 1, 1), jnp.float32)
    gamma = 1.0 + 0.1 * jax.random.normal(ks[8], (out_planes,), jnp.float32)
    beta = 0.1 * jax.random.normal(ks[9], (out_planes,), jnp.float32)
    prelu_a = 0.25 + 0.05 * jax.random.normal(ks[10], (out_planes,), jnp.float32)
    params = (w_down, w_dw1, w_dw2, w_dw3, w_dw4, w_att, w_fuse, gamma, beta, prelu_a)

    out = jax.jit(dilated_parallel_conv_block)(x, params)
    out = jax.block_until_ready(out)

    ref = reference(x, params)
    assert out.shape == (N, out_planes, H, W), out.shape
    np.testing.assert_allclose(np.asarray(out), np.asarray(ref), atol=1e-3, rtol=1e-3)
    print("KERNEL_OK")
</pallas_src>

<mosaic_0001>
module attributes {stable_mosaic.version = 11 : i64} {
  func.func @_dpcb_fused_kernel(%arg0: i32, %arg1: memref<1x8x256xf32, #tpu.memory_space<vmem>>, %arg2: memref<4x8xf32, #tpu.memory_space<vmem>>, %arg3: memref<4x36xf32, #tpu.memory_space<vmem>>, %arg4: memref<4x4xf32, #tpu.memory_space<vmem>>, %arg5: memref<16x16xf32, #tpu.memory_space<vmem>>, %arg6: memref<8x512xf32, #tpu.memory_space<vmem>>, %arg7: memref<1x16x256xf32, #tpu.memory_space<vmem>>, %arg8: memref<1x16x1xf32, #tpu.memory_space<vmem>>, %arg9: memref<1x16x1xf32, #tpu.memory_space<vmem>>, %arg10: memref<4x768xf32, #tpu.memory_space<vmem>>, %arg11: memref<16x256xf32, #tpu.memory_space<vmem>>) attributes {dimension_semantics = [#tpu.dimension_semantics<parallel>], iteration_bounds = array<i64: 2>, scalar_prefetch = 0 : i64, scratch_operands = 2 : i64, tpu.core_type = #tpu.core_type<tc>, window_params = [{transform_indices = @transform_0, window_bounds = array<i64: 1, 8, 256>}, {pipeline_mode = #tpu.pipeline_mode<synchronous>, transform_indices = @transform_1, window_bounds = array<i64: 4, 8>}, {pipeline_mode = #tpu.pipeline_mode<synchronous>, transform_indices = @transform_2, window_bounds = array<i64: 4, 36>}, {pipeline_mode = #tpu.pipeline_mode<synchronous>, transform_indices = @transform_3, window_bounds = array<i64: 4, 4>}, {pipeline_mode = #tpu.pipeline_mode<synchronous>, transform_indices = @transform_4, window_bounds = array<i64: 16, 16>}, {pipeline_mode = #tpu.pipeline_mode<synchronous>, transform_indices = @transform_5, window_bounds = array<i64: 8, 512>}, {transform_indices = @transform_6, window_bounds = array<i64: 1, 16, 256>}, {transform_indices = @transform_7, window_bounds = array<i64: 1, 16, 1>}, {transform_indices = @transform_8, window_bounds = array<i64: 1, 16, 1>}]} {
    %c0 = arith.constant 0 : index
    %c0_0 = arith.constant 0 : index
    %0 = vector.load %arg2[%c0, %c0_0] : memref<4x8xf32, #tpu.memory_space<vmem>>, vector<4x8xf32>
    %c0_1 = arith.constant 0 : index
    %c0_2 = arith.constant 0 : index
    %c0_3 = arith.constant 0 : index
    %1 = vector.load %arg1[%c0_1, %c0_2, %c0_3] : memref<1x8x256xf32, #tpu.memory_space<vmem>>, vector<1x8x256xf32>
    %2 = vector.shape_cast %1 : vector<1x8x256xf32> to vector<8x256xf32>
    %cst = arith.constant dense<0.000000e+00> : vector<4x256xf32>
    %3 = tpu.matmul %0, %2, %cst {dimension_numbers = #tpu.dot_dimension_numbers<[1], [0], [0], [1], [0, 0, 1, 1], [], []>} : vector<4x8xf32>, vector<8x256xf32>, vector<4x256xf32> -> vector<4x256xf32>
    %cst_4 = arith.constant 0.000000e+00 : f32
    %4 = vector.broadcast %cst_4 : f32 to vector<4x256xf32>
    %c0_5 = arith.constant 0 : index
    %c0_6 = arith.constant 0 : index
    %5 = vector.load %arg10[%c0_5, %c0_6] : memref<4x768xf32, #tpu.memory_space<vmem>>, vector<4x256xf32>
    tpu.vector_store %arg10[%c0_5, %c0_6], %4 {strides = array<i32>} : memref<4x768xf32, #tpu.memory_space<vmem>>, vector<4x256xf32>,
    %cst_7 = arith.constant 0.000000e+00 : f32
    %6 = vector.broadcast %cst_7 : f32 to vector<4x256xf32>
    %c0_8 = arith.constant 0 : index
    %c512 = arith.constant 512 : index
    %7 = vector.load %arg10[%c0_8, %c512] : memref<4x768xf32, #tpu.memory_space<vmem>>, vector<4x256xf32>
    tpu.vector_store %arg10[%c0_8, %c512], %6 {strides = array<i32>} : memref<4x768xf32, #tpu.memory_space<vmem>>, vector<4x256xf32>,
    %c0_9 = arith.constant 0 : index
    %c256 = arith.constant 256 : index
    %8 = vector.load %arg10[%c0_9, %c256] : memref<4x768xf32, #tpu.memory_space<vmem>>, vector<4x256xf32>
    tpu.vector_store %arg10[%c0_9, %c256], %3 {strides = array<i32>} : memref<4x768xf32, #tpu.memory_space<vmem>>, vector<4x256xf32>,
    %c0_10 = arith.constant 0 : index
    %c0_11 = arith.constant 0 : index
    %9 = vector.load %arg6[%c0_10, %c0_11] : memref<8x512xf32, #tpu.memory_space<vmem>>, vector<8x512xf32>
    %c0_12 = arith.constant 0 : index
    %c120 = arith.constant 120 : index
    %10 = vector.load %arg10[%c0_12, %c120] : memref<4x768xf32, #tpu.memory_space<vmem>>, vector<4x512xf32>
    %11 = vector.extract_strided_slice %9 {offsets = [0, 0], sizes = [1, 512], strides = [1, 1]} : vector<8x512xf32> to vector<1x512xf32>
    %12 = vector.broadcast %11 : vector<1x512xf32> to vector<4x512xf32>
    %13 = arith.mulf %10, %12 : vector<4x512xf32>
    %c0_13 = arith.constant 0 : index
    %c124 = arith.constant 124 : index
    %14 = vector.load %arg10[%c0_13, %c124] : memref<4x768xf32, #tpu.memory_space<vmem>>, vector<4x512xf32>
    %15 = vector.extract_strided_slice %9 {offsets = [1, 0], sizes = [1, 512], strides = [1, 1]} : vector<8x512xf32> to vector<1x512xf32>
    %16 = vector.broadcast %15 : vector<1x512xf32> to vector<4x512xf32>
    %17 = arith.mulf %14, %16 : vector<4x512xf32>
    %c0_14 = arith.constant 0 : index
    %c126 = arith.constant 126 : index
    %18 = vector.load %arg10[%c0_14, %c126] : memref<4x768xf32, #tpu.memory_space<vmem>>, vector<4x512xf32>
    %19 = vector.extract_strided_slice %9 {offsets = [2, 0], sizes = [1, 512], strides = [1, 1]} : vector<8x512xf32> to vector<1x512xf32>
    %20 = vector.broadcast %19 : vector<1x512xf32> to vector<4x512xf32>
    %21 = arith.mulf %18, %20 : vector<4x512xf32>
    %c0_15 = arith.constant 0 : index
    %c127 = arith.constant 127 : index
    %22 = vector.load %arg10[%c0_15, %c127] : memref<4x768xf32, #tpu.memory_space<vmem>>, vector<4x512xf32>
    %23 = vector.extract_strided_slice %9 {offsets = [3, 0], sizes = [1, 512], strides = [1, 1]} : vector<8x512xf32> to vector<1x512xf32>
    %24 = vector.broadcast %23 : vector<1x512xf32> to vector<4x512xf32>
    %25 = arith.mulf %22, %24 : vector<4x512xf32>
    %c0_16 = arith.constant 0 : index
    %c128 = arith.constant 128 : index
    %26 = vector.load %arg10[%c0_16, %c128] : memref<4x768xf32, #tpu.memory_space<vmem>>, vector<4x512xf32>
    %c0_17 = arith.constant 0 : index
    %c129 = arith.constant 129 : index
    %27 = vector.load %arg10[%c0_17, %c129] : memref<4x768xf32, #tpu.memory_space<vmem>>, vector<4x512xf32>
    %28 = vector.extract_strided_slice %9 {offsets = [4, 0], sizes = [1, 512], strides = [1, 1]} : vector<8x512xf32> to vector<1x512xf32>
    %29 = vector.broadcast %28 : vector<1x512xf32> to vector<4x512xf32>
    %30 = arith.mulf %27, %29 : vector<4x512xf32>
    %c0_18 = arith.constant 0 : index
    %c130 = arith.constant 130 : index
    %31 = vector.load %arg10[%c0_18, %c130] : memref<4x768xf32, #tpu.memory_space<vmem>>, vector<4x512xf32>
    %32 = vector.extract_strided_slice %9 {offsets = [5, 0], sizes = [1, 512], strides = [1, 1]} : vector<8x512xf32> to vector<1x512xf32>
    %33 = vector.broadcast %32 : vector<1x512xf32> to vector<4x512xf32>
    %34 = arith.mulf %31, %33 : vector<4x512xf32>
    %c0_19 = arith.constant 0 : index
    %c132 = arith.constant 132 : index
    %35 = vector.load %arg10[%c0_19, %c132] : memref<4x768xf32, #tpu.memory_space<vmem>>, vector<4x512xf32>
    %36 = vector.extract_strided_slice %9 {offsets = [6, 0], sizes = [1, 512], strides = [1, 1]} : vector<8x512xf32> to vector<1x512xf32>
    %37 = vector.broadcast %36 : vector<1x512xf32> to vector<4x512xf32>
    %38 = arith.mulf %35, %37 : vector<4x512xf32>
    %c0_20 = arith.constant 0 : index
    %c136 = arith.constant 136 : index
    %39 = vector.load %arg10[%c0_20, %c136] : memref<4x768xf32, #tpu.memory_space<vmem>>, vector<4x512xf32>
    %40 = vector.extract_strided_slice %9 {offsets = [7, 0], sizes = [1, 512], strides = [1, 1]} : vector<8x512xf32> to vector<1x512xf32>
    %41 = vector.broadcast %40 : vector<1x512xf32> to vector<4x512xf32>
    %42 = arith.mulf %39, %41 : vector<4x512xf32>
    %c0_21 = arith.constant 0 : index
    %c0_22 = arith.constant 0 : index
    %43 = vector.load %arg3[%c0_21, %c0_22] : memref<4x36xf32, #tpu.memory_space<vmem>>, vector<4x36xf32>
    %c0_23 = arith.constant 0 : index
    %c0_24 = arith.constant 0 : index
    %44 = vector.load %arg4[%c0_23, %c0_24] : memref<4x4xf32, #tpu.memory_space<vmem>>, vector<4x4xf32>
    %45 = vector.extract_strided_slice %25 {offsets = [0, 112], sizes = [4, 256], strides = [1, 1]} : vector<4x512xf32> to vector<4x256xf32>
    %46 = vector.extract_strided_slice %26 {offsets = [0, 112], sizes = [4, 256], strides = [1, 1]} : vector<4x512xf32> to vector<4x256xf32>
    %47 = vector.extract_strided_slice %30 {offsets = [0, 112], sizes = [4, 256], strides = [1, 1]} : vector<4x512xf32> to vector<4x256xf32>
    %48 = vector.extract_strided_slice %25 {offsets = [0, 128], sizes = [4, 256], strides = [1, 1]} : vector<4x512xf32> to vector<4x256xf32>
    %49 = vector.extract_strided_slice %26 {offsets = [0, 128], sizes = [4, 256], strides = [1, 1]} : vector<4x512xf32> to vector<4x256xf32>
    %50 = vector.extract_strided_slice %30 {offsets = [0, 128], sizes = [4, 256], strides = [1, 1]} : vector<4x512xf32> to vector<4x256xf32>
    %51 = vector.extract_strided_slice %25 {offsets = [0, 144], sizes = [4, 256], strides = [1, 1]} : vector<4x512xf32> to vector<4x256xf32>
    %52 = vector.extract_strided_slice %26 {offsets = [0, 144], sizes = [4, 256], strides = [1, 1]} : vector<4x512xf32> to vector<4x256xf32>
    %53 = vector.extract_strided_slice %30 {offsets = [0, 144], sizes = [4, 256], strides = [1, 1]} : vector<4x512xf32> to vector<4x256xf32>
    %54 = arith.addf %45, %46 : vector<4x256xf32>
    %55 = arith.addf %54, %47 : vector<4x256xf32>
    %56 = arith.addf %55, %48 : vector<4x256xf32>
    %57 = arith.addf %56, %49 : vector<4x256xf32>
    %58 = arith.addf %57, %50 : vector<4x256xf32>
    %59 = arith.addf %58, %51 : vector<4x256xf32>
    %60 = arith.addf %59, %52 : vector<4x256xf32>
    %61 = arith.addf %60, %53 : vector<4x256xf32>
    %cst_25 = arith.constant 0.111111112 : f32
    %62 = vector.broadcast %cst_25 : f32 to vector<4x256xf32>
    %63 = arith.mulf %61, %62 : vector<4x256xf32>
    %64 = vector.extract_strided_slice %43 {offsets = [0, 0], sizes = [4, 1], strides = [1, 1]} : vector<4x36xf32> to vector<4x1xf32>
    %65 = vector.broadcast %64 : vector<4x1xf32> to vector<4x256xf32>
    %66 = arith.mulf %45, %65 : vector<4x256xf32>
    %67 = vector.extract_strided_slice %43 {offsets = [0, 1], sizes = [4, 1], strides = [1, 1]} : vector<4x36xf32> to vector<4x1xf32>
    %68 = vector.broadcast %67 : vector<4x1xf32> to vector<4x256xf32>
    %69 = arith.mulf %46, %68 : vector<4x256xf32>
    %70 = arith.addf %66, %69 : vector<4x256xf32>
    %71 = vector.extract_strided_slice %43 {offsets = [0, 2], sizes = [4, 1], strides = [1, 1]} : vector<4x36xf32> to vector<4x1xf32>
    %72 = vector.broadcast %71 : vector<4x1xf32> to vector<4x256xf32>
    %73 = arith.mulf %47, %72 : vector<4x256xf32>
    %74 = arith.addf %70, %73 : vector<4x256xf32>
    %75 = vector.extract_strided_slice %43 {offsets = [0, 3], sizes = [4, 1], strides = [1, 1]} : vector<4x36xf32> to vector<4x1xf32>
    %76 = vector.broadcast %75 : vector<4x1xf32> to vector<4x256xf32>
    %77 = arith.mulf %48, %76 : vector<4x256xf32>
    %78 = arith.addf %74, %77 : vector<4x256xf32>
    %79 = vector.extract_strided_slice %43 {offsets = [0, 4], sizes = [4, 1], strides = [1, 1]} : vector<4x36xf32> to vector<4x1xf32>
    %80 = vector.broadcast %79 : vector<4x1xf32> to vector<4x256xf32>
    %81 = arith.mulf %49, %80 : vector<4x256xf32>
    %82 = arith.addf %78, %81 : vector<4x256xf32>
    %83 = vector.extract_strided_slice %43 {offsets = [0, 5], sizes = [4, 1], strides = [1, 1]} : vector<4x36xf32> to vector<4x1xf32>
    %84 = vector.broadcast %83 : vector<4x1xf32> to vector<4x256xf32>
    %85 = arith.mulf %50, %84 : vector<4x256xf32>
    %86 = arith.addf %82, %85 : vector<4x256xf32>
    %87 = vector.extract_strided_slice %43 {offsets = [0, 6], sizes = [4, 1], strides = [1, 1]} : vector<4x36xf32> to vector<4x1xf32>
    %88 = vector.broadcast %87 : vector<4x1xf32> to vector<4x256xf32>
    %89 = arith.mulf %51, %88 : vector<4x256xf32>
    %90 = arith.addf %86, %89 : vector<4x256xf32>
    %91 = vector.extract_strided_slice %43 {offsets = [0, 7], sizes = [4, 1], strides = [1, 1]} : vector<4x36xf32> to vector<4x1xf32>
    %92 = vector.broadcast %91 : vector<4x1xf32> to vector<4x256xf32>
    %93 = arith.mulf %52, %92 : vector<4x256xf32>
    %94 = arith.addf %90, %93 : vector<4x256xf32>
    %95 = vector.extract_strided_slice %43 {offsets = [0, 8], sizes = [4, 1], strides = [1, 1]} : vector<4x36xf32> to vector<4x1xf32>
    %96 = vector.broadcast %95 : vector<4x1xf32> to vector<4x256xf32>
    %97 = arith.mulf %53, %96 : vector<4x256xf32>
    %98 = arith.addf %94, %97 : vector<4x256xf32>
    %99 = arith.addf %63, %98 : vector<4x256xf32>
    %cst_26 = arith.constant dense<0.000000e+00> : vector<4x256xf32>
    %100 = tpu.matmul %44, %99, %cst_26 {dimension_numbers = #tpu.dot_dimension_numbers<[1], [0], [0], [1], [0, 0, 1, 1], [], []>} : vector<4x4xf32>, vector<4x256xf32>, vector<4x256xf32> -> vector<4x256xf32>
    %101 = vector.extract_strided_slice %100 {offsets = [0, 0], sizes = [1, 256], strides = [1, 1]} : vector<4x256xf32> to vector<1x256xf32>
    %102 = arith.negf %101 : vector<1x256xf32>
    %103 = math.exp %102 : vector<1x256xf32>
    %cst_27 = arith.constant 1.000000e+00 : f32
    %104 = vector.broadcast %cst_27 : f32 to vector<1x256xf32>
    %105 = arith.addf %104, %103 : vector<1x256xf32>
    %106 = arith.divf %104, %105 : vector<1x256xf32>
    %cst_28 = arith.constant 1.000000e+00 : f32
    %107 = vector.broadcast %cst_28 : f32 to vector<1x256xf32>
    %108 = arith.addf %107, %106 : vector<1x256xf32>
    %109 = vector.broadcast %108 : vector<1x256xf32> to vector<4x256xf32>
    %110 = arith.mulf %99, %109 : vector<4x256xf32>
    %c0_29 = arith.constant 0 : index
    %c0_30 = arith.constant 0 : index
    %111 = vector.load %arg11[%c0_29, %c0_30] : memref<16x256xf32, #tpu.memory_space<vmem>>, vector<4x256xf32>
    tpu.vector_store %arg11[%c0_29, %c0_30], %110 {strides = array<i32>} : memref<16x256xf32, #tpu.memory_space<vmem>>, vector<4x256xf32>,
    %112 = vector.extract_strided_slice %21 {offsets = [0, 96], sizes = [4, 256], strides = [1, 1]} : vector<4x512xf32> to vector<4x256xf32>
    %113 = vector.extract_strided_slice %43 {offsets = [0, 9], sizes = [4, 1], strides = [1, 1]} : vector<4x36xf32> to vector<4x1xf32>
    %114 = vector.broadcast %113 : vector<4x1xf32> to vector<4x256xf32>
    %115 = arith.mulf %112, %114 : vector<4x256xf32>
    %116 = vector.extract_strided_slice %26 {offsets = [0, 96], sizes = [4, 256], strides = [1, 1]} : vector<4x512xf32> to vector<4x256xf32>
    %117 = vector.extract_strided_slice %43 {offsets = [0, 10], sizes = [4, 1], strides = [1, 1]} : vector<4x36xf32> to vector<4x1xf32>
    %118 = vector.broadcast %117 : vector<4x1xf32> to vector<4x256xf32>
    %119 = arith.mulf %116, %118 : vector<4x256xf32>
    %120 = arith.addf %115, %119 : vector<4x256xf32>
    %121 = vector.extract_strided_slice %34 {offsets = [0, 96], sizes = [4, 256], strides = [1, 1]} : vector<4x512xf32> to vector<4x256xf32>
    %122 = vector.extract_strided_slice %43 {offsets = [0, 11], sizes = [4, 1], strides = [1, 1]} : vector<4x36xf32> to vector<4x1xf32>
    %123 = vector.broadcast %122 : vector<4x1xf32> to vector<4x256xf32>
    %124 = arith.mulf %121, %123 : vector<4x256xf32>
    %125 = arith.addf %120, %124 : vector<4x256xf32>
    %126 = vector.extract_strided_slice %21 {offsets = [0, 128], sizes = [4, 256], strides = [1, 1]} : vector<4x512xf32> to vector<4x256xf32>
    %127 = vector.extract_strided_slice %43 {offsets = [0, 12], sizes = [4, 1], strides = [1, 1]} : vector<4x36xf32> to vector<4x1xf32>
    %128 = vector.broadcast %127 : vector<4x1xf32> to vector<4x256xf32>
    %129 = arith.mulf %126, %128 : vector<4x256xf32>
    %130 = arith.addf %125, %129 : vector<4x256xf32>
    %131 = vector.extract_strided_slice %26 {offsets = [0, 128], sizes = [4, 256], strides = [1, 1]} : vector<4x512xf32> to vector<4x256xf32>
    %132 = vector.extract_strided_slice %43 {offsets = [0, 13], sizes = [4, 1], strides = [1, 1]} : vector<4x36xf32> to vector<4x1xf32>
    %133 = vector.broadcast %132 : vector<4x1xf32> to vector<4x256xf32>
    %134 = arith.mulf %131, %133 : vector<4x256xf32>
    %135 = arith.addf %130, %134 : vector<4x256xf32>
    %136 = vector.extract_strided_slice %34 {offsets = [0, 128], sizes = [4, 256], strides = [1, 1]} : vector<4x512xf32> to vector<4x256xf32>
    %137 = vector.extract_strided_slice %43 {offsets = [0, 14], sizes = [4, 1], strides = [1, 1]} : vector<4x36xf32> to vector<4x1xf32>
    %138 = vector.broadcast %137 : vector<4x1xf32> to vector<4x256xf32>
    %139 = arith.mulf %136, %138 : vector<4x256xf32>
    %140 = arith.addf %135, %139 : vector<4x256xf32>
    %141 = vector.extract_strided_slice %21 {offsets = [0, 160], sizes = [4, 256], strides = [1, 1]} : vector<4x512xf32> to vector<4x256xf32>
    %142 = vector.extract_strided_slice %43 {offsets = [0, 15], sizes = [4, 1], strides = [1, 1]} : vector<4x36xf32> to vector<4x1xf32>
    %143 = vector.broadcast %142 : vector<4x1xf32> to vector<4x256xf32>
    %144 = arith.mulf %141, %143 : vector<4x256xf32>
    %145 = arith.addf %140, %144 : vector<4x256xf32>
    %146 = vector.extract_strided_slice %26 {offsets = [0, 160], sizes = [4, 256], strides = [1, 1]} : vector<4x512xf32> to vector<4x256xf32>
    %147 = vector.extract_strided_slice %43 {offsets = [0, 16], sizes = [4, 1], strides = [1, 1]} : vector<4x36xf32> to vector<4x1xf32>
    %148 = vector.broadcast %147 : vector<4x1xf32> to vector<4x256xf32>
    %149 = arith.mulf %146, %148 : vector<4x256xf32>
    %150 = arith.addf %145, %149 : vector<4x256xf32>
    %151 = vector.extract_strided_slice %34 {offsets = [0, 160], sizes = [4, 256], strides = [1, 1]} : vector<4x512xf32> to vector<4x256xf32>
    %152 = vector.extract_strided_slice %43 {offsets = [0, 17], sizes = [4, 1], strides = [1, 1]} : vector<4x36xf32> to vector<4x1xf32>
    %153 = vector.broadcast %152 : vector<4x1xf32> to vector<4x256xf32>
    %154 = arith.mulf %151, %153 : vector<4x256xf32>
    %155 = arith.addf %150, %154 : vector<4x256xf32>
    %156 = arith.addf %99, %155 : vector<4x256xf32>
    %cst_31 = arith.constant dense<0.000000e+00> : vector<4x256xf32>
    %157 = tpu.matmul %44, %156, %cst_31 {dimension_numbers = #tpu.dot_dimension_numbers<[1], [0], [0], [1], [0, 0, 1, 1], [], []>} : vector<4x4xf32>, vector<4x256xf32>, vector<4x256xf32> -> vector<4x256xf32>
    %158 = vector.extract_strided_slice %157 {offsets = [1, 0], sizes = [1, 256], strides = [1, 1]} : vector<4x256xf32> to vector<1x256xf32>
    %159 = arith.negf %158 : vector<1x256xf32>
    %160 = math.exp %159 : vector<1x256xf32>
    %cst_32 = arith.constant 1.000000e+00 : f32
    %161 = vector.broadcast %cst_32 : f32 to vector<1x256xf32>
    %162 = arith.addf %161, %160 : vector<1x256xf32>
    %163 = arith.divf %161, %162 : vector<1x256xf32>
    %cst_33 = arith.constant 1.000000e+00 : f32
    %164 = vector.broadcast %cst_33 : f32 to vector<1x256xf32>
    %165 = arith.addf %164, %163 : vector<1x256xf32>
    %166 = vector.broadcast %165 : vector<1x256xf32> to vector<4x256xf32>
    %167 = arith.mulf %156, %166 : vector<4x256xf32>
    %c4 = arith.constant 4 : index
    %c0_34 = arith.constant 0 : index
    %168 = vector.load %arg11[%c4, %c0_34] : memref<16x256xf32, #tpu.memory_space<vmem>>, vector<4x256xf32>
    tpu.vector_store %arg11[%c4, %c0_34], %167 {strides = array<i32>} : memref<16x256xf32, #tpu.memory_space<vmem>>, vector<4x256xf32>,
    %169 = vector.extract_strided_slice %17 {offsets = [0, 64], sizes = [4, 256], strides = [1, 1]} : vector<4x512xf32> to vector<4x256xf32>
    %170 = vector.extract_strided_slice %43 {offsets = [0, 18], sizes = [4, 1], strides = [1, 1]} : vector<4x36xf32> to vector<4x1xf32>
    %171 = vector.broadcast %170 : vector<4x1xf32> to vector<4x256xf32>
    %172 = arith.mulf %169, %171 : vector<4x256xf32>
    %173 = vector.extract_strided_slice %26 {offsets = [0, 64], sizes = [4, 256], strides = [1, 1]} : vector<4x512xf32> to vector<4x256xf32>
    %174 = vector.extract_strided_slice %43 {offsets = [0, 19], sizes = [4, 1], strides = [1, 1]} : vector<4x36xf32> to vector<4x1xf32>
    %175 = vector.broadcast %174 : vector<4x1xf32> to vector<4x256xf32>
    %176 = arith.mulf %173, %175 : vector<4x256xf32>
    %177 = arith.addf %172, %176 : vector<4x256xf32>
    %178 = vector.extract_strided_slice %38 {offsets = [0, 64], sizes = [4, 256], strides = [1, 1]} : vector<4x512xf32> to vector<4x256xf32>
    %179 = vector.extract_strided_slice %43 {offsets = [0, 20], sizes = [4, 1], strides = [1, 1]} : vector<4x36xf32> to vector<4x1xf32>
    %180 = vector.broadcast %179 : vector<4x1xf32> to vector<4x256xf32>
    %181 = arith.mulf %178, %180 : vector<4x256xf32>
    %182 = arith.addf %177, %181 : vector<4x256xf32>
    %183 = vector.extract_strided_slice %17 {offsets = [0, 128], sizes = [4, 256], strides = [1, 1]} : vector<4x512xf32> to vector<4x256xf32>
    %184 = vector.extract_strided_slice %43 {offsets = [0, 21], sizes = [4, 1], strides = [1, 1]} : vector<4x36xf32> to vector<4x1xf32>
    %185 = vector.broadcast %184 : vector<4x1xf32> to vector<4x256xf32>
    %186 = arith.mulf %183, %185 : vector<4x256xf32>
    %187 = arith.addf %182, %186 : vector<4x256xf32>
    %188 = vector.extract_strided_slice %26 {offsets = [0, 128], sizes = [4, 256], strides = [1, 1]} : vector<4x512xf32> to vector<4x256xf32>
    %189 = vector.extract_strided_slice %43 {offsets = [0, 22], sizes = [4, 1], strides = [1, 1]} : vector<4x36xf32> to vector<4x1xf32>
    %190 = vector.broadcast %189 : vector<4x1xf32> to vector<4x256xf32>
    %191 = arith.mulf %188, %190 : vector<4x256xf32>
    %192 = arith.addf %187, %191 : vector<4x256xf32>
    %193 = vector.extract_strided_slice %38 {offsets = [0, 128], sizes = [4, 256], strides = [1, 1]} : vector<4x512xf32> to vector<4x256xf32>
    %194 = vector.extract_strided_slice %43 {offsets = [0, 23], sizes = [4, 1], strides = [1, 1]} : vector<4x36xf32> to vector<4x1xf32>
    %195 = vector.broadcast %194 : vector<4x1xf32> to vector<4x256xf32>
    %196 = arith.mulf %193, %195 : vector<4x256xf32>
    %197 = arith.addf %192, %196 : vector<4x256xf32>
    %198 = vector.extract_strided_slice %17 {offsets = [0, 192], sizes = [4, 256], strides = [1, 1]} : vector<4x512xf32> to vector<4x256xf32>
    %199 = vector.extract_strided_slice %43 {offsets = [0, 24], sizes = [4, 1], strides = [1, 1]} : vector<4x36xf32> to vector<4x1xf32>
    %200 = vector.broadcast %199 : vector<4x1xf32> to vector<4x256xf32>
    %201 = arith.mulf %198, %200 : vector<4x256xf32>
    %202 = arith.addf %197, %201 : vector<4x256xf32>
    %203 = vector.extract_strided_slice %26 {offsets = [0, 192], sizes = [4, 256], strides = [1, 1]} : vector<4x512xf32> to vector<4x256xf32>
    %204 = vector.extract_strided_slice %43 {offsets = [0, 25], sizes = [4, 1], strides = [1, 1]} : vector<4x36xf32> to vector<4x1xf32>
    %205 = vector.broadcast %204 : vector<4x1xf32> to vector<4x256xf32>
    %206 = arith.mulf %203, %205 : vector<4x256xf32>
    %207 = arith.addf %202, %206 : vector<4x256xf32>
    %208 = vector.extract_strided_slice %38 {offsets = [0, 192], sizes = [4, 256], strides = [1, 1]} : vector<4x512xf32> to vector<4x256xf32>
    %209 = vector.extract_strided_slice %43 {offsets = [0, 26], sizes = [4, 1], strides = [1, 1]} : vector<4x36xf32> to vector<4x1xf32>
    %210 = vector.broadcast %209 : vector<4x1xf32> to vector<4x256xf32>
    %211 = arith.mulf %208, %210 : vector<4x256xf32>
    %212 = arith.addf %207, %211 : vector<4x256xf32>
    %213 = arith.addf %156, %212 : vector<4x256xf32>
    %cst_35 = arith.constant dense<0.000000e+00> : vector<4x256xf32>
    %214 = tpu.matmul %44, %213, %cst_35 {dimension_numbers = #tpu.dot_dimension_numbers<[1], [0], [0], [1], [0, 0, 1, 1], [], []>} : vector<4x4xf32>, vector<4x256xf32>, vector<4x256xf32> -> vector<4x256xf32>
    %215 = vector.extract_strided_slice %214 {offsets = [2, 0], sizes = [1, 256], strides = [1, 1]} : vector<4x256xf32> to vector<1x256xf32>
    %216 = arith.negf %215 : vector<1x256xf32>
    %217 = math.exp %216 : vector<1x256xf32>
    %cst_36 = arith.constant 1.000000e+00 : f32
    %218 = vector.broadcast %cst_36 : f32 to vector<1x256xf32>
    %219 = arith.addf %218, %217 : vector<1x256xf32>
    %220 = arith.divf %218, %219 : vector<1x256xf32>
    %cst_37 = arith.constant 1.000000e+00 : f32
    %221 = vector.broadcast %cst_37 : f32 to vector<1x256xf32>
    %222 = arith.addf %221, %220 : vector<1x256xf32>
    %223 = vector.broadcast %222 : vector<1x256xf32> to vector<4x256xf32>
    %224 = arith.mulf %213, %223 : vector<4x256xf32>
    %c8 = arith.constant 8 : index
    %c0_38 = arith.constant 0 : index
    %225 = vector.load %arg11[%c8, %c0_38] : memref<16x256xf32, #tpu.memory_space<vmem>>, vector<4x256xf32>
    tpu.vector_store %arg11[%c8, %c0_38], %224 {strides = array<i32>} : memref<16x256xf32, #tpu.memory_space<vmem>>, vector<4x256xf32>,
    %226 = vector.extract_strided_slice %13 {offsets = [0, 0], sizes = [4, 256], strides = [1, 1]} : vector<4x512xf32> to vector<4x256xf32>
    %227 = vector.extract_strided_slice %43 {offsets = [0, 27], sizes = [4, 1], strides = [1, 1]} : vector<4x36xf32> to vector<4x1xf32>
    %228 = vector.broadcast %227 : vector<4x1xf32> to vector<4x256xf32>
    %229 = arith.mulf %226, %228 : vector<4x256xf32>
    %230 = vector.extract_strided_slice %26 {offsets = [0, 0], sizes = [4, 256], strides = [1, 1]} : vector<4x512xf32> to vector<4x256xf32>
    %231 = vector.extract_strided_slice %43 {offsets = [0, 28], sizes = [4, 1], strides = [1, 1]} : vector<4x36xf32> to vector<4x1xf32>
    %232 = vector.broadcast %231 : vector<4x1xf32> to vector<4x256xf32>
    %233 = arith.mulf %230, %232 : vector<4x256xf32>
    %234 = arith.addf %229, %233 : vector<4x256xf32>
    %235 = vector.extract_strided_slice %42 {offsets = [0, 0], sizes = [4, 256], strides = [1, 1]} : vector<4x512xf32> to vector<4x256xf32>
    %236 = vector.extract_strided_slice %43 {offsets = [0, 29], sizes = [4, 1], strides = [1, 1]} : vector<4x36xf32> to vector<4x1xf32>
    %237 = vector.broadcast %236 : vector<4x1xf32> to vector<4x256xf32>
    %238 = arith.mulf %235, %237 : vector<4x256xf32>
    %239 = arith.addf %234, %238 : vector<4x256xf32>
    %240 = vector.extract_strided_slice %13 {offsets = [0, 128], sizes = [4, 256], strides = [1, 1]} : vector<4x512xf32> to vector<4x256xf32>
    %241 = vector.extract_strided_slice %43 {offsets = [0, 30], sizes = [4, 1], strides = [1, 1]} : vector<4x36xf32> to vector<4x1xf32>
    %242 = vector.broadcast %241 : vector<4x1xf32> to vector<4x256xf32>
    %243 = arith.mulf %240, %242 : vector<4x256xf32>
    %244 = arith.addf %239, %243 : vector<4x256xf32>
    %245 = vector.extract_strided_slice %26 {offsets = [0, 128], sizes = [4, 256], strides = [1, 1]} : vector<4x512xf32> to vector<4x256xf32>
    %246 = vector.extract_strided_slice %43 {offsets = [0, 31], sizes = [4, 1], strides = [1, 1]} : vector<4x36xf32> to vector<4x1xf32>
    %247 = vector.broadcast %246 : vector<4x1xf32> to vector<4x256xf32>
    %248 = arith.mulf %245, %247 : vector<4x256xf32>
    %249 = arith.addf %244, %248 : vector<4x256xf32>
    %250 = vector.extract_strided_slice %42 {offsets = [0, 128], sizes = [4, 256], strides = [1, 1]} : vector<4x512xf32> to vector<4x256xf32>
    %251 = vector.extract_strided_slice %43 {offsets = [0, 32], sizes = [4, 1], strides = [1, 1]} : vector<4x36xf32> to vector<4x1xf32>
    %252 = vector.broadcast %251 : vector<4x1xf32> to vector<4x256xf32>
    %253 = arith.mulf %250, %252 : vector<4x256xf32>
    %254 = arith.addf %249, %253 : vector<4x256xf32>
    %255 = vector.extract_strided_slice %13 {offsets = [0, 256], sizes = [4, 256], strides = [1, 1]} : vector<4x512xf32> to vector<4x256xf32>
    %256 = vector.extract_strided_slice %43 {offsets = [0, 33], sizes = [4, 1], strides = [1, 1]} : vector<4x36xf32> to vector<4x1xf32>
    %257 = vector.broadcast %256 : vector<4x1xf32> to vector<4x256xf32>
    %258 = arith.mulf %255, %257 : vector<4x256xf32>
    %259 = arith.addf %254, %258 : vector<4x256xf32>
    %260 = vector.extract_strided_slice %26 {offsets = [0, 256], sizes = [4, 256], strides = [1, 1]} : vector<4x512xf32> to vector<4x256xf32>
    %261 = vector.extract_strided_slice %43 {offsets = [0, 34], sizes = [4, 1], strides = [1, 1]} : vector<4x36xf32> to vector<4x1xf32>
    %262 = vector.broadcast %261 : vector<4x1xf32> to vector<4x256xf32>
    %263 = arith.mulf %260, %262 : vector<4x256xf32>
    %264 = arith.addf %259, %263 : vector<4x256xf32>
    %265 = vector.extract_strided_slice %42 {offsets = [0, 256], sizes = [4, 256], strides = [1, 1]} : vector<4x512xf32> to vector<4x256xf32>
    %266 = vector.extract_strided_slice %43 {offsets = [0, 35], sizes = [4, 1], strides = [1, 1]} : vector<4x36xf32> to vector<4x1xf32>
    %267 = vector.broadcast %266 : vector<4x1xf32> to vector<4x256xf32>
    %268 = arith.mulf %265, %267 : vector<4x256xf32>
    %269 = arith.addf %264, %268 : vector<4x256xf32>
    %270 = arith.addf %213, %269 : vector<4x256xf32>
    %cst_39 = arith.constant dense<0.000000e+00> : vector<4x256xf32>
    %271 = tpu.matmul %44, %270, %cst_39 {dimension_numbers = #tpu.dot_dimension_numbers<[1], [0], [0], [1], [0, 0, 1, 1], [], []>} : vector<4x4xf32>, vector<4x256xf32>, vector<4x256xf32> -> vector<4x256xf32>
    %272 = vector.extract_strided_slice %271 {offsets = [3, 0], sizes = [1, 256], strides = [1, 1]} : vector<4x256xf32> to vector<1x256xf32>
    %273 = arith.negf %272 : vector<1x256xf32>
    %274 = math.exp %273 : vector<1x256xf32>
    %cst_40 = arith.constant 1.000000e+00 : f32
    %275 = vector.broadcast %cst_40 : f32 to vector<1x256xf32>
    %276 = arith.addf %275, %274 : vector<1x256xf32>
    %277 = arith.divf %275, %276 : vector<1x256xf32>
    %cst_41 = arith.constant 1.000000e+00 : f32
    %278 = vector.broadcast %cst_41 : f32 to vector<1x256xf32>
    %279 = arith.addf %278, %277 : vector<1x256xf32>
    %280 = vector.broadcast %279 : vector<1x256xf32> to vector<4x256xf32>
    %281 = arith.mulf %270, %280 : vector<4x256xf32>
    %c12 = arith.constant 12 : index
    %c0_42 = arith.constant 0 : index
    %282 = vector.load %arg11[%c12, %c0_42] : memref<16x256xf32, #tpu.memory_space<vmem>>, vector<4x256xf32>
    tpu.vector_store %arg11[%c12, %c0_42], %281 {strides = array<i32>} : memref<16x256xf32, #tpu.memory_space<vmem>>, vector<4x256xf32>,
    %c0_43 = arith.constant 0 : index
    %c0_44 = arith.constant 0 : index
    %283 = vector.load %arg5[%c0_43, %c0_44] : memref<16x16xf32, #tpu.memory_space<vmem>>, vector<16x16xf32>
    %c0_45 = arith.constant 0 : index
    %c0_46 = arith.constant 0 : index
    %284 = vector.load %arg11[%c0_45, %c0_46] : memref<16x256xf32, #tpu.memory_space<vmem>>, vector<16x256xf32>
    %cst_47 = arith.constant dense<0.000000e+00> : vector<16x256xf32>
    %285 = tpu.matmul %283, %284, %cst_47 {dimension_numbers = #tpu.dot_dimension_numbers<[1], [0], [0], [1], [0, 0, 1, 1], [], []>} : vector<16x16xf32>, vector<16x256xf32>, vector<16x256xf32> -> vector<16x256xf32>
    %c0_48 = arith.constant 0 : index
    %c0_49 = arith.constant 0 : index
    %c0_50 = arith.constant 0 : index
    %286 = vector.load %arg7[%c0_48, %c0_49, %c0_50] : memref<1x16x256xf32, #tpu.memory_space<vmem>>, vector<1x16x256xf32>
    %287 = vector.shape_cast %286 : vector<1x16x256xf32> to vector<16x256xf32>
    %288 = vector.shape_cast %285 : vector<16x256xf32> to vector<1x16x256xf32>
    tpu.vector_store %arg7[%c0_48, %c0_49, %c0_50], %288 {strides = array<i32>} : memref<1x16x256xf32, #tpu.memory_space<vmem>>, vector<1x16x256xf32>,
    %cst_51 = arith.constant dense<0.000000e+00> : vector<16xf32>
    %289 = vector.multi_reduction <add>, %285, %cst_51 [1] : vector<16x256xf32> to vector<16xf32>
    %290 = vector.shape_cast %289 : vector<16xf32> to vector<16x1xf32>
    %c0_52 = arith.constant 0 : index
    %c0_53 = arith.constant 0 : index
    %c0_54 = arith.constant 0 : index
    %291 = vector.load %arg8[%c0_52, %c0_53, %c0_54] : memref<1x16x1xf32, #tpu.memory_space<vmem>>, vector<1x16x1xf32>
    %292 = vector.shape_cast %291 : vector<1x16x1xf32> to vector<16x1xf32>
    %293 = vector.shape_cast %290 : vector<16x1xf32> to vector<1x16x1xf32>
    tpu.vector_store %arg8[%c0_52, %c0_53, %c0_54], %293 {strides = array<i32>} : memref<1x16x1xf32, #tpu.memory_space<vmem>>, vector<1x16x1xf32>,
    %294 = arith.mulf %285, %285 : vector<16x256xf32>
    %cst_55 = arith.constant dense<0.000000e+00> : vector<16xf32>
    %295 = vector.multi_reduction <add>, %294, %cst_55 [1] : vector<16x256xf32> to vector<16xf32>
    %296 = vector.shape_cast %295 : vector<16xf32> to vector<16x1xf32>
    %c0_56 = arith.constant 0 : index
    %c0_57 = arith.constant 0 : index
    %c0_58 = arith.constant 0 : index
    %297 = vector.load %arg9[%c0_56, %c0_57, %c0_58] : memref<1x16x1xf32, #tpu.memory_space<vmem>>, vector<1x16x1xf32>
    %298 = vector.shape_cast %297 : vector<1x16x1xf32> to vector<16x1xf32>
    %299 = vector.shape_cast %296 : vector<16x1xf32> to vector<1x16x1xf32>
    tpu.vector_store %arg9[%c0_56, %c0_57, %c0_58], %299 {strides = array<i32>} : memref<1x16x1xf32, #tpu.memory_space<vmem>>, vector<1x16x1xf32>,
    return
  }
  func.func @transform_0(%arg0: i32) -> (i32, i32, i32) {
    %c0_i32 = arith.constant 0 : i32
    %c0_i32_0 = arith.constant 0 : i32
    %c0_i32_1 = arith.constant 0 : i32
    return %arg0, %c0_i32, %c0_i32_0 : i32, i32, i32
  }
  func.func @transform_1(%arg0: i32) -> (i32, i32) {
    %c0_i32 = arith.constant 0 : i32
    %c0_i32_0 = arith.constant 0 : i32
    %c0_i32_1 = arith.constant 0 : i32
    return %c0_i32, %c0_i32_0 : i32, i32
  }
  func.func @transform_2(%arg0: i32) -> (i32, i32) {
    %c0_i32 = arith.constant 0 : i32
    %c0_i32_0 = arith.constant 0 : i32
    %c0_i32_1 = arith.constant 0 : i32
    return %c0_i32, %c0_i32_0 : i32, i32
  }
  func.func @transform_3(%arg0: i32) -> (i32, i32) {
    %c0_i32 = arith.constant 0 : i32
    %c0_i32_0 = arith.constant 0 : i32
    %c0_i32_1 = arith.constant 0 : i32
    return %c0_i32, %c0_i32_0 : i32, i32
  }
  func.func @transform_4(%arg0: i32) -> (i32, i32) {
    %c0_i32 = arith.constant 0 : i32
    %c0_i32_0 = arith.constant 0 : i32
    %c0_i32_1 = arith.constant 0 : i32
    return %c0_i32, %c0_i32_0 : i32, i32
  }
  func.func @transform_5(%arg0: i32) -> (i32, i32) {
    %c0_i32 = arith.constant 0 : i32
    %c0_i32_0 = arith.constant 0 : i32
    %c0_i32_1 = arith.constant 0 : i32
    return %c0_i32, %c0_i32_0 : i32, i32
  }
  func.func @transform_6(%arg0: i32) -> (i32, i32, i32) {
    %c0_i32 = arith.constant 0 : i32
    %c0_i32_0 = arith.constant 0 : i32
    %c0_i32_1 = arith.constant 0 : i32
    return %arg0, %c0_i32, %c0_i32_0 : i32, i32, i32
  }
  func.func @transform_7(%arg0: i32) -> (i32, i32, i32) {
    %c0_i32 = arith.constant 0 : i32
    %c0_i32_0 = arith.constant 0 : i32
    %c0_i32_1 = arith.constant 0 : i32
    return %arg0, %c0_i32, %c0_i32_0 : i32, i32, i32
  }
  func.func @transform_8(%arg0: i32) -> (i32, i32, i32) {
    %c0_i32 = arith.constant 0 : i32
    %c0_i32_0 = arith.constant 0 : i32
    %c0_i32_1 = arith.constant 0 : i32
    return %arg0, %c0_i32, %c0_i32_0 : i32, i32, i32
  }
}

module attributes {stable_mosaic.version = 11 : i64} {
  func.func @_bn_prelu_kernel(%arg0: i32, %arg1: i32, %arg2: memref<32x256xf32, #tpu.memory_space<vmem>>, %arg3: memref<32x1xf32, #tpu.memory_space<vmem>>, %arg4: memref<32x1xf32, #tpu.memory_space<vmem>>, %arg5: memref<32x1xf32, #tpu.memory_space<vmem>>, %arg6: memref<32x256xf32, #tpu.memory_space<vmem>>) attributes {dimension_semantics = [#tpu.dimension_semantics<parallel>, #tpu.dimension_semantics<parallel>], iteration_bounds = array<i64: 1, 1>, scalar_prefetch = 0 : i64, scratch_operands = 0 : i64, tpu.core_type = #tpu.core_type<tc>, window_params = [{transform_indices = @transform_0, window_bounds = array<i64: 32, 256>}, {transform_indices = @transform_1, window_bounds = array<i64: 32, 1>}, {transform_indices = @transform_2, window_bounds = array<i64: 32, 1>}, {transform_indices = @transform_3, window_bounds = array<i64: 32, 1>}, {transform_indices = @transform_4, window_bounds = array<i64: 32, 256>}]} {
    %c0 = arith.constant 0 : index
    %c0_0 = arith.constant 0 : index
    %0 = vector.load %arg2[%c0, %c0_0] : memref<32x256xf32, #tpu.memory_space<vmem>>, vector<32x256xf32>
    %c0_1 = arith.constant 0 : index
    %c0_2 = arith.constant 0 : index
    %1 = vector.load %arg3[%c0_1, %c0_2] : memref<32x1xf32, #tpu.memory_space<vmem>>, vector<32x1xf32>
    %2 = vector.broadcast %1 : vector<32x1xf32> to vector<32x256xf32>
    %3 = arith.mulf %0, %2 : vector<32x256xf32>
    %c0_3 = arith.constant 0 : index
    %c0_4 = arith.constant 0 : index
    %4 = vector.load %arg4[%c0_3, %c0_4] : memref<32x1xf32, #tpu.memory_space<vmem>>, vector<32x1xf32>
    %5 = vector.broadcast %4 : vector<32x1xf32> to vector<32x256xf32>
    %6 = arith.addf %3, %5 : vector<32x256xf32>
    %cst = arith.constant 0.000000e+00 : f32
    %7 = vector.broadcast %cst : f32 to vector<32x256xf32>
    %8 = arith.cmpf oge, %6, %7 : vector<32x256xf32>
    %c0_5 = arith.constant 0 : index
    %c0_6 = arith.constant 0 : index
    %9 = vector.load %arg5[%c0_5, %c0_6] : memref<32x1xf32, #tpu.memory_space<vmem>>, vector<32x1xf32>
    %10 = vector.broadcast %9 : vector<32x1xf32> to vector<32x256xf32>
    %11 = arith.mulf %10, %6 : vector<32x256xf32>
    %12 = arith.select %8, %6, %11 : vector<32x256xi1>, vector<32x256xf32>
    %c0_7 = arith.constant 0 : index
    %c0_8 = arith.constant 0 : index
    %13 = vector.load %arg6[%c0_7, %c0_8] : memref<32x256xf32, #tpu.memory_space<vmem>>, vector<32x256xf32>
    tpu.vector_store %arg6[%c0_7, %c0_8], %12 {strides = array<i32>} : memref<32x256xf32, #tpu.memory_space<vmem>>, vector<32x256xf32>,
    return
  }
  func.func @transform_0(%arg0: i32, %arg1: i32) -> (i32, i32) {
    %c0_i32 = arith.constant 0 : i32
    return %arg0, %arg1 : i32, i32
  }
  func.func @transform_1(%arg0: i32, %arg1: i32) -> (i32, i32) {
    %c0_i32 = arith.constant 0 : i32
    %c0_i32_0 = arith.constant 0 : i32
    return %arg0, %c0_i32 : i32, i32
  }
  func.func @transform_2(%arg0: i32, %arg1: i32) -> (i32, i32) {
    %c0_i32 = arith.constant 0 : i32
    %c0_i32_0 = arith.constant 0 : i32
    return %arg0, %c0_i32 : i32, i32
  }
  func.func @transform_3(%arg0: i32, %arg1: i32) -> (i32, i32) {
    %c0_i32 = arith.constant 0 : i32
    %c0_i32_0 = arith.constant 0 : i32
    return %arg0, %c0_i32 : i32, i32
  }
  func.func @transform_4(%arg0: i32, %arg1: i32) -> (i32, i32) {
    %c0_i32 = arith.constant 0 : i32
    return %arg0, %arg1 : i32, i32
  }
}

</mosaic_0001>

<bundles_post_ra>
// kernel: dilated_parallel_conv_block.3
= control target key start
LH: loop header
LB: loop body
LE: loop exit
PB: predicated region body
PF: predicated region fallthrough
CT: control target
= control target key end

     0   :  { %9 = vsyncpa [#allocation3], 0  ;;  %s467_s0 = inlined_call_operand.hbm [shape: f32[32,256], index: 0, kind: input, shape index: {}, may-alias: {0,4}]   ;;  %s468_s1 = inlined_call_operand.hbm [shape: f32[32,1], index: 1, kind: input, shape index: {}]   ;;  %s469_s2 = inlined_call_operand.hbm [shape: f32[32,1], index: 2, kind: input, shape index: {}]   ;;  %s470_s3 = inlined_call_operand.hbm [shape: f32[32,1], index: 3, kind: input, shape index: {}]   ;;  %s471_s4 = inlined_call_operand.hbm [shape: f32[32,256], index: 4, kind: output, shape index: {}, may-alias: {0,4}]  }
   0x1   :  { %10 = vsyncpa [#allocation6], 0 }
   0x2   :  { %11 = vsyncpa [#allocation9], 0 }
   0x3   :  { %12 = vsyncpa [#allocation4], 0  ;;  %s350_s15 = smov [#allocation5]   ;;  %s232_s19 = scalar_lea.hbm %s468_s1, 512 }
   0x4   :  { %s30_s16 = sshll.u32 %s350_s15, 4  ;;  %p233_p0 = scmp.ne.s32.totalorder %s468_s1, %s232_s19  ;;  %s31_s16 = int_to_ptr.vmem [resolvable:$true] %s30_s16 }
   0x5   :  { %p236_p1 = scmp.lt.u32.totalorder %s232_s19, %s468_s1 }
   0x7   :  { %p238_p2 = pnand %p236_p1, %p233_p0 }
   0x9   :  { %241 = shalt.err (!%p238_p2)
}
   0xa   :  { %s242_s24 = scalar_lea.vmem %s31_s16, 512  ;;  %p247_p4 = scmp.lt.s32.totalorder %s31_s16, %s31_s16 }
   0xb   :  { %p243_p3 = scmp.ne.s32.totalorder %s31_s16, %s242_s24  ;;  %p248_p5 = scmp.lt.s32.totalorder %s242_s24, %s242_s24 }
   0xd   :  { %p249_p6 = por %p248_p5, %p247_p4 }
   0xf   :  { %p250_p7 = pnand %p249_p6, %p243_p3 }
  0x11   :  { %253 = shalt.err (!%p250_p7)
}
  0x12   :  { %s351_s25 = smov 128   ;;  %s352_s26 = smov 8  }
  0x13   :  { %36 = dma.hbm_to_vmem [thread:$0]  %s468_s1, 512, %s31_s16, [#allocation6], %s351_s25, %s351_s25, %s352_s26  }
  0x14   :  { %s353_s29 = smov [#allocation2]   ;;  %s254_s7 = scalar_lea.hbm %s467_s0, 1024 }
  0x15   :  { %s18_s30 = sshll.u32 %s353_s29, 4  ;;  %p255_p8 = scmp.ne.s32.totalorder %s467_s0, %s254_s7  ;;  %s19_s30 = int_to_ptr.vmem [resolvable:$true] %s18_s30 }
  0x16   :  { %p258_p9 = scmp.lt.u32.totalorder %s254_s7, %s467_s0 }
  0x18   :  { %p260_p10 = pnand %p258_p9, %p255_p8 }
  0x1a   :  { %263 = shalt.err (!%p260_p10)
}
  0x1b   :  { %s264_s12 = scalar_lea.vmem %s19_s30, 1024  ;;  %p269_p12 = scmp.lt.s32.totalorder %s19_s30, %s19_s30 }
  0x1c   :  { %p265_p11 = scmp.ne.s32.totalorder %s19_s30, %s264_s12  ;;  %p270_p13 = scmp.lt.s32.totalorder %s264_s12, %s264_s12 }
  0x1e   :  { %p271_p0 = por %p270_p13, %p269_p12 }
  0x20   :  { %p272_p1 = pnand %p271_p0, %p265_p11 }
  0x22   :  { %275 = shalt.err (!%p272_p1)
}
  0x23   :  { %s354_s1 = smov 256   ;;  %s355_s13 = smov 16  }
  0x24   :  { %24 = dma.hbm_to_vmem [thread:$0]  %s467_s0, 1024, %s19_s30, [#allocation3], %s354_s1, %s354_s1, %s355_s13  }
  0x25   :  { %s356_s16 = smov [#allocation7]   ;;  %s357_s18 = smov [#allocation8]  }
  0x26   :  { %s42_s17 = sshll.u32 %s356_s16, 4  ;;  %s54_s19 = sshll.u32 %s357_s18, 4  ;;  %s43_s17 = int_to_ptr.vmem [resolvable:$true] %s42_s17  ;;  %s415_s19 = int_to_ptr.vmem [resolvable:$true] %s54_s19 }
  0x27   :  { %s276_s22 = scalar_lea.hbm %s469_s2, 512 }
  0x28   :  { %p277_p2 = scmp.ne.s32.totalorder %s469_s2, %s276_s22  ;;  %p280_p3 = scmp.lt.u32.totalorder %s276_s22, %s469_s2 }
  0x2a   :  { %p282_p4 = pnand %p280_p3, %p277_p2 }
  0x2c   :  { %285 = shalt.err (!%p282_p4)
}
  0x2d   :  { %s286_s0 = scalar_lea.vmem %s43_s17, 512  ;;  %p291_p6 = scmp.lt.s32.totalorder %s43_s17, %s43_s17 }
  0x2e   :  { %p287_p5 = scmp.ne.s32.totalorder %s43_s17, %s286_s0  ;;  %p292_p7 = scmp.lt.s32.totalorder %s286_s0, %s286_s0 }
  0x30   :  { %p293_p8 = por %p292_p7, %p291_p6 }
  0x32   :  { %p294_p9 = pnand %p293_p8, %p287_p5 }
  0x34   :  { %297 = shalt.err (!%p294_p9)
}
  0x35   :  { %48 = dma.hbm_to_vmem [thread:$0]  %s469_s2, 512, %s43_s17, [#allocation6], %s351_s25, %s351_s25, %s352_s26  }
  0x36   :  { %s298_s7 = scalar_lea.hbm %s470_s3, 512 }
  0x37   :  { %p299_p10 = scmp.ne.s32.totalorder %s470_s3, %s298_s7  ;;  %p302_p11 = scmp.lt.u32.totalorder %s298_s7, %s470_s3 }
  0x39   :  { %p304_p12 = pnand %p302_p11, %p299_p10 }
  0x3b   :  { %307 = shalt.err (!%p304_p12)
}
  0x3c   :  { %s308_s12 = scalar_lea.vmem %s415_s19, 512  ;;  %p313_p0 = scmp.lt.s32.totalorder %s415_s19, %s415_s19 }
  0x3d   :  { %p309_p13 = scmp.ne.s32.totalorder %s415_s19, %s308_s12  ;;  %p314_p1 = scmp.lt.s32.totalorder %s308_s12, %s308_s12 }
  0x3f   :  { %p315_p2 = por %p314_p1, %p313_p0 }
  0x41   :  { %p316_p3 = pnand %p315_p2, %p309_p13 }
  0x43   :  { %319 = shalt.err (!%p316_p3)
}
  0x44   :  { %60 = dma.hbm_to_vmem [thread:$0]  %s470_s3, 512, %s415_s19, [#allocation9], %s351_s25, %s351_s25, %s352_s26  }
  0x45   :  { %342 = dma.done.wait [#allocation3], 1024  }
  0x46   :  { %343 = vsyncadd [#allocation3], 4294966272 }
  0x47   :  { %344 = dma.done.wait [#allocation6], 1024  }
  0x48   :  { %345 = vsyncadd [#allocation6], 4294966272 }
  0x49   :  { %346 = dma.done.wait [#allocation9], 512  }
  0x4a   :  { %347 = vsyncadd [#allocation9], 4294966784  ;;  %v358_v0 = vmov 0   ;;  %v83_v1 = vld [vmem:[#allocation5 + $0x10] sm:$0xff]  ;;  %v81_v2 = vld [vmem:[#allocation5] sm:$0xff]  ;;  %s359_s3 = smov [#allocation10]  }
  0x4b   :  { %231 = vset.pattern.permute.xlu1 %v358_v0  ;;  %230 = vset.pattern.permute.xlu0 %v358_v0  ;;  %v84_v3 = vld [vmem:[#allocation5 + $0x18] sm:$0xff]  ;;  %v82_v4 = vld [vmem:[#allocation5 + $0x8] sm:$0xff]  ;;  %v113_v6 = vld [vmem:[#allocation7] sm:$0xff]  ;;  %s206_s25 = sshll.u32 %s359_s3, 4  ;;  %s207_s25 = int_to_ptr.vmem [resolvable:$true] %s206_s25 }
  0x4c   :  { %97 = vperm.xlu1 %231, %v83_v1   ;;  %87 = vperm.xlu0 %230, %v81_v2   ;;  %v114_v5 = vld [vmem:[#allocation7 + $0x8] sm:$0xff]  ;;  %v116_v7 = vld [vmem:[#allocation7 + $0x18] sm:$0xff]  ;;  %v115_v8 = vld [vmem:[#allocation7 + $0x10] sm:$0xff]  ;;  %s320_s26 = scalar_lea.vmem %s207_s25, 1024  ;;  %p325_p5 = scmp.lt.s32.totalorder %s207_s25, %s207_s25 }
  0x4d   :  { %v154_v9 = vld [vmem:[#allocation8 + $0x8] sm:$0xff]  ;;  %v153_v10 = vld [vmem:[#allocation8] sm:$0xff]  ;;  %v156_v11 = vld [vmem:[#allocation8 + $0x18] sm:$0xff]  ;;  %p321_p4 = scmp.ne.s32.totalorder %s207_s25, %s320_s26  ;;  %p326_p6 = scmp.lt.s32.totalorder %s320_s26, %s320_s26 }
  0x4e   :  { %v155_v12 = vld [vmem:[#allocation8 + $0x10] sm:$0xff]  ;;  %v73_v17 = vld [vmem:[#allocation2] sm:$0xff]  ;;  %v74_v18 = vld [vmem:[#allocation2 + $0x8] sm:$0xff] }
  0x4f   :  { %v75_v19 = vld [vmem:[#allocation2 + $0x10] sm:$0xff]  ;;  %v76_v20 = vld [vmem:[#allocation2 + $0x18] sm:$0xff]  ;;  %v77_v27 = vld [vmem:[#allocation2 + $0x20] sm:$0xff]  ;;  %p327_p7 = por %p326_p6, %p325_p5 }
  0x50   :  { %102 = vperm.xlu1 %231, %v84_v3   ;;  %92 = vperm.xlu0 %230, %v82_v4   ;;  %v78_v28 = vld [vmem:[#allocation2 + $0x28] sm:$0xff]  ;;  %v79_v29 = vld [vmem:[#allocation2 + $0x30] sm:$0xff]  ;;  %v80_v30 = vld [vmem:[#allocation2 + $0x38] sm:$0xff] }
  0x51   :  { %p328_p8 = pnand %p327_p7, %p321_p4 }
  0x54   :  { %124 = vperm.xlu1 %231, %v114_v5   ;;  %119 = vperm.xlu0 %230, %v113_v6  }
  0x58   :  { %134 = vperm.xlu1 %231, %v116_v7   ;;  %129 = vperm.xlu0 %230, %v115_v8  }
  0x5c   :  { %164 = vperm.xlu1 %231, %v154_v9   ;;  %159 = vperm.xlu0 %230, %v153_v10  }
  0x60   :  { %174 = vperm.xlu1 %231, %v156_v11   ;;  %169 = vperm.xlu0 %230, %v155_v12  }
  0xcb   :  { %v98_v13 = vpop.permute.xlu1 %97  ;;  %v88_v14 = vpop.permute.xlu0 %87 }
  0xcc   :  { %v105_v23 = vmul.f32 %v88_v14, %v73_v17  ;;  %v106_v24 = vmul.f32 %v88_v14, %v74_v18  ;;  %v109_v37 = vmul.f32 %v98_v13, %v77_v27  ;;  %v110_v38 = vmul.f32 %v98_v13, %v78_v28 }
  0xcf   :  { %v103_v15 = vpop.permute.xlu1 %102  ;;  %v93_v16 = vpop.permute.xlu0 %92 }
  0xd0   :  { %v107_v25 = vmul.f32 %v93_v16, %v75_v19  ;;  %v108_v26 = vmul.f32 %v93_v16, %v76_v20  ;;  %v111_v39 = vmul.f32 %v103_v15, %v79_v29  ;;  %v112_v40 = vmul.f32 %v103_v15, %v80_v30 }
  0xd3   :  { %v125_v21 = vpop.permute.xlu1 %124  ;;  %v120_v22 = vpop.permute.xlu0 %119 }
  0xd4   :  { %v139_v31 = vadd.f32 %v125_v21, %v107_v25  ;;  %v140_v32 = vadd.f32 %v125_v21, %v108_v26  ;;  %v137_v33 = vadd.f32 %v120_v22, %v105_v23  ;;  %v138_v34 = vadd.f32 %v120_v22, %v106_v24 }
  0xd6   :  { %vm147_vm0 = vcmp.ge.f32.partialorder %v139_v31, 0.0  ;;  %vm148_vm1 = vcmp.ge.f32.partialorder %v140_v32, 0.0  ;;  %vm145_vm2 = vcmp.ge.f32.partialorder %v137_v33, 0.0  ;;  %vm146_vm3 = vcmp.ge.f32.partialorder %v138_v34, 0.0 }
  0xd7   :  { %v135_v35 = vpop.permute.xlu1 %134  ;;  %v130_v36 = vpop.permute.xlu0 %129 }
  0xd8   :  { %v143_v47 = vadd.f32 %v135_v35, %v111_v39  ;;  %v144_v48 = vadd.f32 %v135_v35, %v112_v40  ;;  %v141_v49 = vadd.f32 %v130_v36, %v109_v37  ;;  %v142_v50 = vadd.f32 %v130_v36, %v110_v38 }
  0xda   :  { %vm151_vm4 = vcmp.ge.f32.partialorder %v143_v47, 0.0  ;;  %vm152_vm5 = vcmp.ge.f32.partialorder %v144_v48, 0.0  ;;  %vm149_vm6 = vcmp.ge.f32.partialorder %v141_v49, 0.0  ;;  %vm150_vm7 = vcmp.ge.f32.partialorder %v142_v50, 0.0 }
  0xdb   :  { %v165_v41 = vpop.permute.xlu1 %164  ;;  %v160_v42 = vpop.permute.xlu0 %159 }
  0xdc   :  { %v179_v43 = vmul.f32 %v165_v41, %v139_v31  ;;  %v180_v44 = vmul.f32 %v165_v41, %v140_v32  ;;  %v177_v45 = vmul.f32 %v160_v42, %v137_v33  ;;  %v178_v46 = vmul.f32 %v160_v42, %v138_v34 }
  0xde   :  { %v187_v51 = vsel %vm147_vm0, %v139_v31, %v179_v43  ;;  %v188_v52 = vsel %vm148_vm1, %v140_v32, %v180_v44  ;;  %v185_v53 = vsel %vm145_vm2, %v137_v33, %v177_v45  ;;  %v186_v54 = vsel %vm146_vm3, %v138_v34, %v178_v46 }
  0xdf   :  { %195 = vst [vmem:[#allocation10 + $0x10] sm:$0xff] %v187_v51  ;;  %196 = vst [vmem:[#allocation10 + $0x18] sm:$0xff] %v188_v52  ;;  %v175_v55 = vpop.permute.xlu1 %174  ;;  %v170_v56 = vpop.permute.xlu0 %169 }
  0xe0   :  { %193 = vst [vmem:[#allocation10] sm:$0xff] %v185_v53  ;;  %194 = vst [vmem:[#allocation10 + $0x8] sm:$0xff] %v186_v54  ;;  %v183_v57 = vmul.f32 %v175_v55, %v143_v47  ;;  %v184_v58 = vmul.f32 %v175_v55, %v144_v48  ;;  %v181_v59 = vmul.f32 %v170_v56, %v141_v49 }
  0xe1   :  { %v182_v60 = vmul.f32 %v170_v56, %v142_v50 }
  0xe2   :  { %v191_v61 = vsel %vm151_vm4, %v143_v47, %v183_v57  ;;  %v192_v62 = vsel %vm152_vm5, %v144_v48, %v184_v58  ;;  %v189_v63 = vsel %vm149_vm6, %v141_v49, %v181_v59 }
  0xe3   :  { %v190_v0 = vsel %vm150_vm7, %v142_v50, %v182_v60  ;;  %199 = vst [vmem:[#allocation10 + $0x30] sm:$0xff] %v191_v61  ;;  %200 = vst [vmem:[#allocation10 + $0x38] sm:$0xff] %v192_v62 }
  0xe4   :  { %197 = vst [vmem:[#allocation10 + $0x20] sm:$0xff] %v189_v63  ;;  %198 = vst [vmem:[#allocation10 + $0x28] sm:$0xff] %v190_v0 }
  0xe5   :  { %331 = shalt.err (!%p328_p8)
}
  0xe6   :  { %s332_s17 = scalar_lea.hbm %s471_s4, 1024 }
  0xe7   :  { %p333_p9 = scmp.ne.s32.totalorder %s471_s4, %s332_s17  ;;  %p336_p10 = scmp.lt.u32.totalorder %s332_s17, %s471_s4 }
  0xe9   :  { %p338_p11 = pnand %p336_p10, %p333_p9 }
  0xeb   :  { %341 = shalt.err (!%p338_p11)
}
  0xec   :  { %212 = dma.vmem_to_hbm [thread:$0]  %s207_s25, 1024, %s471_s4, [#allocation4], %s354_s1, %s354_s1, %s355_s13  }
  0xed   :  { %348 = dma.done.wait [#allocation4], 1024  }
  0xee   :  { %349 = vsyncadd [#allocation4], 4294966272 }
  0xef   :  { %216 = vsyncpa [#allocation3], 1 }
  0xf0   :  { %217 = vsyncpa [#allocation6], 1 }
  0xf1   :  { %218 = vsyncpa [#allocation9], 1 }
  0xf2   :  { %219 = vsyncpa [#allocation4], 1 }

// kernel: dilated_parallel_conv_block.2
= control target key start
LH: loop header
LB: loop body
LE: loop exit
PB: predicated region body
PF: predicated region fallthrough
CT: control target
= control target key end

     0   :  { %s4331_s0 = inlined_call_operand.hbm [shape: f32[2,8,256], index: 0, kind: input, shape index: {}]   ;;  %s4332_s1 = inlined_call_operand.hbm [shape: f32[4,8], index: 1, kind: input, shape index: {}]   ;;  %s4333_s2 = inlined_call_operand.hbm [shape: f32[4,36], index: 2, kind: input, shape index: {}]   ;;  %s4334_s3 = inlined_call_operand.hbm [shape: f32[4,4], index: 3, kind: input, shape index: {}]   ;;  %s4335_s4 = inlined_call_operand.hbm [shape: f32[16,16], index: 4, kind: input, shape index: {}]   ;;  %s4336_s5 = inlined_call_operand.hbm [shape: f32[8,512], index: 5, kind: input, shape index: {}]   ;;  %s4337_s6 = inlined_call_operand.hbm [shape: f32[2,16,256], index: 6, kind: output, shape index: {0}]   ;;  %s4338_s7 = inlined_call_operand.hbm [shape: f32[2,16,1], index: 7, kind: output, shape index: {1}]   ;;  %s4339_s8 = inlined_call_operand.hbm [shape: f32[2,16,1], index: 8, kind: output, shape index: {2}]  }
   0x1   :  { %4355 = sst [smem:[#allocation25_spill]] %s4331_s0 }
   0x2   :  { %14 = vsyncpa [#allocation5], 0 }
   0x3   :  { %16 = vsyncpa [#allocation5 + $0x1], 0 }
   0x4   :  { %17 = vsyncpa [#allocation8], 0 }
   0x5   :  { %18 = vsyncpa [#allocation11], 0 }
   0x6   :  { %19 = vsyncpa [#allocation14], 0 }
   0x7   :  { %20 = vsyncpa [#allocation6], 0 }
   0x8   :  { %22 = vsyncpa [#allocation6 + $0x1], 0 }
   0x9   :  { %23 = vsyncpa [#allocation17], 0 }
   0xa   :  { %25 = vsyncpa [#allocation17 + $0x1], 0  ;;  %s3211_s27 = smov 0   ;;  %s3213_s28 = smov 0  }
   0xb   :  { %s3215_s29 = smov 0   ;;  %s3217_s30 = smov 0  }
   0xc LB: > { %s3092_s9 = smov [#allocation7]   ;;  %s3232_s11 = sadd.s32 4294967295, %s3090_s30   ;;  %s3090_s30 = sphi %s3217_s30, %s4387_s30   ;;  %s3086_s29 = sphi %s3215_s29, %s4386_s29   ;;  %s3082_s28 = sphi %s3213_s28, %s4385_s28   ;;  %s3078_s27 = sphi %s3211_s27, %s4384_s27  }
   0xd   : > { %s258_s10 = sshll.u32 %s3092_s9, 4  ;;  %p2477_p0 = scmp.ge.s32.totalorder %s3090_s30, 1  ;;  %s3237_s10 = int_to_ptr.vmem [resolvable:$true] %s258_s10 }
   0xe   : > { %p4340_p1 = scmp.eq.s32.totalorder %s3232_s11, 0  ;;  %p245_p2 = scmp.lt.s32.totalorder %s3090_s30, 3 }
   0xf   : > { %s3093_s13 = smov [#allocation10]   ;;  %s3094_s15 = smov [#allocation9]  }
  0x10   : > { %p3239_p3 = pnand %p2477_p0, %p245_p2  ;;  %s280_s14 = sshll.u32 %s3093_s13, 4  ;;  %s3246_s14 = int_to_ptr.vmem [resolvable:$true] %s280_s14 }
  0x11   : > { %s269_s16 = sshll.u32 %s3094_s15, 4  ;;  %s3095_s18 = smov [#allocation12]   ;;  %s3254_s16 = int_to_ptr.vmem [resolvable:$true] %s269_s16 }
  0x12   : > { %s4356_s12 = scalar_select %p3239_p3, 1, 0 }
  0x13   : > { %p2567_p5 = pneg %p3239_p3  ;;  %s3256_s19 = sshll.u32 %s3095_s18, 4  ;;  %s291_s19 = int_to_ptr.vmem [resolvable:$true] %s3256_s19 }
  0x14   : > { %s2782_s22 = scalar_lea.hbm %s4332_s1, 64 }
  0x15   : > { %p3250_p6 = pnand %p2567_p5, %p4340_p1  ;;  %p2783_p7 = scmp.ne.s32.totalorder %s4332_s1, %s2782_s22 }
  0x16   : > { %p2789_p11 = scmp.lt.u32.totalorder %s2782_s22, %s4332_s1 }
  0x17   : > { %p3266_p8 = pneg %p3250_p6 }
  0x19   : > { %p2785_p9 = pnand %p3266_p8, %p2783_p7 }
  0x1b   : > { %p2786_p10 = pneg %p2785_p9 }
  0x1d   : > { %p2791_p12 = pnand %p2789_p11, %p2786_p10 }
  0x1f   : > { %2794 = shalt.err (!%p2791_p12)
}
  0x20   : > { %s2795_s13 = scalar_lea.vmem %s3237_s10, 64  ;;  %p2803_p5 = scmp.lt.s32.totalorder %s3237_s10, %s3237_s10 }
  0x21   : > { %p2796_p13 = scmp.ne.s32.totalorder %s3237_s10, %s2795_s13  ;;  %p2804_p4 = scmp.lt.s32.totalorder %s2795_s13, %s2795_s13 }
  0x23   : > { %p2798_p0 = pnand %p2796_p13, %p3266_p8  ;;  %p2805_p7 = por %p2804_p4, %p2803_p5 }
  0x25   : > { %p2799_p2 = pneg %p2798_p0 }
  0x27   : > { %p2806_p9 = pnand %p2805_p7, %p2799_p2 }
  0x29   : > { %2809 = shalt.err (!%p2806_p9)
}
  0x2a   : > { %2570 = dma.hbm_to_vmem [thread:$0]  (!%p3250_p6), %s4332_s1, 64, %s3237_s10, [#allocation8]  }
  0x2b   : > { %s2810_s22 = scalar_lea.hbm %s4334_s3, 64 }
  0x2c   : > { %p2811_p10 = scmp.ne.s32.totalorder %s4334_s3, %s2810_s22  ;;  %p2817_p12 = scmp.lt.u32.totalorder %s2810_s22, %s4334_s3 }
  0x2e   : > { %p2813_p4 = pnand %p2811_p10, %p3266_p8 }
  0x30   : > { %p2814_p11 = pneg %p2813_p4 }
  0x32   : > { %p2819_p13 = pnand %p2817_p12, %p2814_p11 }
  0x34   : > { %2822 = shalt.err (!%p2819_p13)
}
  0x35   : > { %s2823_s10 = scalar_lea.vmem %s3246_s14, 64  ;;  %p2831_p7 = scmp.lt.s32.totalorder %s3246_s14, %s3246_s14 }
  0x36   : > { %p2824_p0 = scmp.ne.s32.totalorder %s3246_s14, %s2823_s10  ;;  %p2832_p9 = scmp.lt.s32.totalorder %s2823_s10, %s2823_s10 }
  0x38   : > { %p2826_p2 = pnand %p2824_p0, %p3266_p8  ;;  %p2833_p10 = por %p2832_p9, %p2831_p7 }
  0x3a   : > { %p2827_p5 = pneg %p2826_p2 }
  0x3c   : > { %p2834_p4 = pnand %p2833_p10, %p2827_p5 }
  0x3e   : > { %2837 = shalt.err (!%p2834_p4)
}
  0x3f   : > { %2576 = dma.hbm_to_vmem [thread:$0]  (!%p3250_p6), %s4334_s3, 64, %s3246_s14, [#allocation11]  }
  0x40   : > { %s2838_s21 = scalar_lea.hbm %s4333_s2, 64 }
  0x41   : > { %p2839_p11 = scmp.ne.s32.totalorder %s4333_s2, %s2838_s21  ;;  %p2845_p0 = scmp.lt.u32.totalorder %s2838_s21, %s4333_s2 }
  0x43   : > { %p2841_p12 = pnand %p2839_p11, %p3266_p8 }
  0x45   : > { %p2842_p13 = pneg %p2841_p12 }
  0x47   : > { %p2847_p2 = pnand %p2845_p0, %p2842_p13 }
  0x49   : > { %2850 = shalt.err (!%p2847_p2)
}
  0x4a   : > { %s2851_s14 = scalar_lea.vmem %s3254_s16, 64  ;;  %p2859_p10 = scmp.lt.s32.totalorder %s3254_s16, %s3254_s16 }
  0x4b   : > { %p2852_p5 = scmp.ne.s32.totalorder %s3254_s16, %s2851_s14  ;;  %p2860_p4 = scmp.lt.s32.totalorder %s2851_s14, %s2851_s14 }
  0x4d   : > { %p2854_p7 = pnand %p2852_p5, %p3266_p8  ;;  %p2861_p11 = por %p2860_p4, %p2859_p10 }
  0x4f   : > { %p2855_p9 = pneg %p2854_p7 }
  0x51   : > { %p2862_p12 = pnand %p2861_p11, %p2855_p9 }
  0x53   : > { %2865 = shalt.err (!%p2862_p12)
}
  0x54   : > { %2573 = dma.hbm_to_vmem [thread:$0]  (!%p3250_p6), %s4333_s2, 64, %s3254_s16, [#allocation8]  }
  0x55   : > { %s2866_s18 = scalar_lea.hbm %s4335_s4, 256 }
  0x56   : > { %p2867_p13 = scmp.ne.s32.totalorder %s4335_s4, %s2866_s18  ;;  %p2873_p5 = scmp.lt.u32.totalorder %s2866_s18, %s4335_s4 }
  0x58   : > { %p2869_p0 = pnand %p2867_p13, %p3266_p8 }
  0x5a   : > { %p2870_p2 = pneg %p2869_p0 }
  0x5c   : > { %p2875_p7 = pnand %p2873_p5, %p2870_p2 }
  0x5e   : > { %2878 = shalt.err (!%p2875_p7)
}
  0x5f   : > { %s2879_s24 = scalar_lea.vmem %s291_s19, 256  ;;  %p2887_p11 = scmp.lt.s32.totalorder %s291_s19, %s291_s19 }
  0x60   : > { %p2880_p9 = scmp.ne.s32.totalorder %s291_s19, %s2879_s24  ;;  %p2888_p12 = scmp.lt.s32.totalorder %s2879_s24, %s2879_s24 }
  0x62   : > { %p2882_p10 = pnand %p2880_p9, %p3266_p8  ;;  %p2889_p1 = por %p2888_p12, %p2887_p11 }
  0x64   : > { %p2883_p4 = pneg %p2882_p10 }
  0x66   : > { %p2890_p3 = pnand %p2889_p1, %p2883_p4 }
  0x68   : > { %2893 = shalt.err (!%p2890_p3)
}
  0x69   : > { %s3096_s16 = smov 128   ;;  %s3097_s26 = smov 8  }
  0x6a   : > { %2579 = dma.hbm_to_vmem [thread:$0]  (!%p3250_p6), %s4335_s4, 256, %s291_s19, [#allocation11], %s3096_s16, %s3096_s16, %s3097_s26  }
  0x6b   : > { %s3098_s10 = smov [#allocation13]   ;;  %s2894_s20 = scalar_lea.hbm %s4336_s5, 512 }
  0x6c   : > { %s304_s13 = sshll.u32 %s3098_s10, 4  ;;  %p2895_p1 = scmp.ne.s32.totalorder %s4336_s5, %s2894_s20  ;;  %s305_s13 = int_to_ptr.vmem [resolvable:$true] %s304_s13 }
  0x6d   : > { %p2901_p0 = scmp.lt.u32.totalorder %s2894_s20, %s4336_s5 }
  0x6e   : > { %p2897_p3 = pnand %p2895_p1, %p3266_p8 }
  0x70   : > { %p2898_p13 = pneg %p2897_p3 }
  0x72   : > { %p2903_p2 = pnand %p2901_p0, %p2898_p13 }
  0x74   : > { %2906 = shalt.err (!%p2903_p2)
}
  0x75   : > { %s2907_s19 = scalar_lea.vmem %s305_s13, 512  ;;  %p2915_p10 = scmp.lt.s32.totalorder %s305_s13, %s305_s13 }
  0x76   : > { %p2908_p5 = scmp.ne.s32.totalorder %s305_s13, %s2907_s19  ;;  %p2916_p4 = scmp.lt.s32.totalorder %s2907_s19, %s2907_s19 }
  0x78   : > { %p2910_p7 = pnand %p2908_p5, %p3266_p8  ;;  %p2917_p11 = por %p2916_p4, %p2915_p10 }
  0x7a   : > { %p2911_p9 = pneg %p2910_p7 }
  0x7c   : > { %p2918_p12 = pnand %p2917_p11, %p2911_p9 }
  0x7e   : > { %2921 = shalt.err (!%p2918_p12)
}
  0x7f   : > { %2582 = dma.hbm_to_vmem [thread:$0]  (!%p3250_p6), %s4336_s5, 512, %s305_s13, [#allocation14]  }
  0x80   : > { %s4342_s17 = sadd.s32 4294967294, %s3090_s30   ;;  %s3372_s25 = sadd.s32 1, %s3090_s30  }
  0x81   : > { %s38_s14 = sadd.s32 1, %s3086_s29  ;;  %s35_s9 = ssub.s32 %s3090_s30, %s3372_s25 }
  0x82   : > { %p45_p8 = scmp.ne.s32.totalorder %s3086_s29, %s3082_s28  ;;  %p36_p1 = scmp.eq.s32.totalorder %s35_s9, 0 }
  0x83   : > { %p46_p3 = scmp.eq.s32.totalorder %s3090_s30, 0  ;;  %p51_p13 = scmp.ne.s32.totalorder %s3082_s28, %s3078_s27 }
  0x84   : > { %p180_p0 = scmp.eq.s32.totalorder %s3232_s11, 1  ;;  %p4359_p5 = scmp.eq.s32.totalorder %s3232_s11, 0 }
  0x85   : > { %s3384_s10 = scalar_select %p36_p1, %s3086_s29, %s38_s14  }
  0x86   : > { %p47_p2 = por %p46_p3, %p45_p8  ;;  %p3388_p7 = por %p4359_p5, %p51_p13 }
  0x87   : > { %p3392_p6 = por %p180_p0, %p45_p8  ;;  %p186_p9 = scmp.eq.s32.totalorder %s4342_s17, 1 }
  0x88   : > { %p2602_p10 = scmp.lt.s32.totalorder %s3090_s30, 2  ;;  %s315_s18 = sand.u32 1, %s3086_s29  }
  0x89   : > { %s4361_s13 = scalar_select %p3392_p6, 1, 0 }
  0x8a   : > { %p3400_p4 = por %p186_p9, %p51_p13  ;;  %s2484_s21 = sshll.u32 %s315_s18, 4 }
  0x8b   : > { %s2531_s22 = sshll.u32 %s3090_s30, 8  ;;  %s4363_s0 = sld [smem:[#allocation25_spill]] }
  0x8c   : > { %s4362_s20 = scalar_select %p3400_p4, 1, 0 }
  0x8d   : > { %s319_s16 = scalar_lea.vmem [#allocation4], %s2484_s21  ;;  %p3410_p11 = pnand %p2602_p10, %p47_p2 }
  0x8e   : > { %s327_s26 = sshll.u32 %s319_s16, 4  ;;  %s316_s9 = scalar_lea.sflag [#allocation5], %s315_s18  ;;  %s3414_s26 = int_to_ptr.vmem [resolvable:$true] %s327_s26 }
  0x8f   : > { %p2924_p8 = pneg %p3410_p11 }
  0x91   : > { %s3408_s19 = scalar_lea.hbm %s4363_s0, %s2531_s22  ;;  %s2927_s23 = scalar_lea.hbm %s4363_s0, 512 }
  0x92   : > { %s2922_s17 = scalar_lea.hbm %s3408_s19, 256  ;;  %p2928_p13 = scmp.lt.u32.totalorder %s3408_s19, %s4363_s0 }
  0x93   : > { %p2923_p12 = scmp.ne.s32.totalorder %s3408_s19, %s2922_s17  ;;  %p2929_p0 = scmp.lt.u32.totalorder %s2927_s23, %s2922_s17 }
  0x94   : > { %p2931_p5 = scmp.lt.u32.totalorder %s2922_s17, %s3408_s19 }
  0x95   : > { %p2925_p1 = pnand %p2924_p8, %p2923_p12  ;;  %p2930_p2 = por %p2929_p0, %p2928_p13 }
  0x97   : > { %p2926_p3 = pneg %p2925_p1  ;;  %p2932_p9 = por %p2931_p5, %p2930_p2 }
  0x99   : > { %p2933_p10 = pnand %p2932_p9, %p2926_p3 }
  0x9b   : > { %2936 = shalt.err (!%p2933_p10)
}
  0x9c   : > { %s2937_s18 = scalar_lea.vmem %s3414_s26, 256  ;;  %s3099_s22 = smov [#allocation4]  }
  0x9d   : > { %p2938_p12 = scmp.ne.s32.totalorder %s3414_s26, %s2937_s18  ;;  %s2942_s21 = sshll.u32 %s3099_s22, 4  ;;  %s2943_s21 = int_to_ptr.vmem [resolvable:$false] %s2942_s21 }
  0x9e   : > { %s2944_s24 = scalar_lea.vmem %s2943_s21, 512  ;;  %p2945_p6 = scmp.lt.s32.totalorder %s3414_s26, %s2943_s21 }
  0x9f   : > { %p2940_p1 = pnand %p2938_p12, %p2924_p8  ;;  %p2946_p13 = scmp.lt.s32.totalorder %s2944_s24, %s2937_s18 }
  0xa1   : > { %p2941_p4 = pneg %p2940_p1  ;;  %p2947_p0 = por %p2946_p13, %p2945_p6 }
  0xa3   : > { %p2948_p2 = pnand %p2947_p0, %p2941_p4 }
  0xa5   : > { %2951 = shalt.err (!%p2948_p2)
}
  0xa6   : > { %2586 = dma.hbm_to_vmem [thread:$0]  (!%p3410_p11), %s3408_s19, 256, %s3414_s26, %s316_s9  }
  0xa7   : > { %p4365_p3 = scmp.ne.s32.totalorder %s4356_s12, 0 }
  0xa8   : > { %s3444_s17 = sand.u32 (!%p4365_p3), 1, %s3082_s28  }
  0xa9   : > { %336 = sbr.rel (%p4365_p3) target bundleno = 1469 (0x5bd), region = 44  ;;  %s3447_s23 = sshll.u32 (!%p4365_p3), %s3444_s17, 4 }
  0xaa   : > { %s339_s16 = scalar_lea.sflag (!%p4365_p3), [#allocation5], %s3444_s17  ;;  %s342_s18 = scalar_lea.vmem (!%p4365_p3), [#allocation4], %s3447_s23 }
  0xb0   : > { %3053 = dma.done.wait (%p3388_p7), %s339_s16, 256  }
  0xb1   : > { %3055 = vsyncadd (%p3388_p7), %s339_s16, 4294967040  ;;  %p4366_p6 = scmp.eq.s32.totalorder %s3232_s11, 0 }
  0xb3   : > { %3057 = dma.done.wait (%p4366_p6), [#allocation8], 128   ;;  %p4367_p4 = pmov %p4366_p6 }
  0xb5   : > { %3059 = vsyncadd (%p4367_p4), [#allocation8], 4294967168  ;;  %p4368_p11 = pmov %p4367_p4 }
  0xb6   : > { %p4369_p8 = pmov %p4367_p4 }
  0xb7   : > { %3061 = dma.done.wait (%p4368_p11), [#allocation11], 320  }
  0xb8   : > { %3063 = vsyncadd (%p4369_p8), [#allocation11], 4294966976  ;;  %p4370_p5 = pmov %p4367_p4 }
  0xb9   : > { %p4371_p9 = pmov %p4367_p4 }
  0xba   : > { %3065 = dma.done.wait (%p4370_p5), [#allocation14], 512  }
  0xbb   : > { %3067 = vsyncadd (%p4371_p9), [#allocation14], 4294966784  ;;  %v3100_v0 = vmov 29   ;;  %v3101_v1 = vmov 0.0   ;;  %v497_v2 = vlaneseq  ;;  %v3102_v3 = vmov 28   ;;  %v407_v8 = vld [vmem:[%s342_s18 + $0x8] sm:$0xff] }
  0xbc   : > { %2712 = vset.pattern.permute.xlu1 %v3100_v0  ;;  %476 = vmatprep.mubr.f32.mxu0 %v3101_v1  ;;  %483 = vst [vmem:[#allocation2] sm:$0xff] %v3101_v1  ;;  %484 = vst [vmem:[#allocation2 + $0x10] sm:$0xff] %v3101_v1  ;;  %v3473_v7 = vld [vmem:[#allocation9] sm:$0xf]  ;;  %vm408_vm0 = vcmask 64512   ;;  %v3476_v11 = vld [vmem:[#allocation13] sm:$0xff] }
  0xbd   : > { %2711 = vset.pattern.permute.xlu0 %v3102_v3  ;;  %1127 = vmatprep.mubr.f32.mxu1 %v3101_v1  ;;  %v3467_v4 = vshrl.u32 %v497_v2, 7  ;;  %v406_v9 = vld [vmem:[%s342_s18] sm:$0xff]  ;;  %v3103_v21 = vmov 30   ;;  %v3104_v26 = vmov 31   ;;  %s3105_s12 = smov 120   ;;  %s4348_s15 = smov 8  }
  0xbe   : > { %1832 = vperm.xlu1 %2712, %v3473_v7   ;;  %412 = vmatprep.subr.mxu0 %v407_v8  ;;  %v405_v10 = vld [vmem:[#allocation7] sm:$0xf]  ;;  %v3478_v12 = vld [vmem:[#allocation13 + $0x8] sm:$0xff]  ;;  %v3485_v16 = vld [vmem:[#allocation13 + $0x10] sm:$0xff]  ;;  %v3107_v29 = vmov 32   ;;  %v3108_v30 = vmov 35  }
  0xbf   : > { %v765_v5 = vsub.s32 7, %v3467_v4  ;;  %v3471_v6 = vsub.s32 0, %v3467_v4  ;;  %413 = vmatpush1.msra.mxu0 %v406_v9  ;;  %1811 = vperm.xlu0 %2711, %v3473_v7   ;;  %v3487_v17 = vld [vmem:[#allocation13 + $0x18] sm:$0xff]  ;;  %v3109_v31 = vmov 34   ;;  %v3508_v32 = vsub.s32 2, %v3467_v4  ;;  %s4346_s19 = smov 126  }
  0xc0   : > { %2497 = vmatmul.mubr.msk.f32.vlgmr.msra.gmra.mrb[0].mxu0 %vm408_vm0, %v405_v10  ;;  %v3110_v33 = vmov 10   ;;  %v3513_v34 = vsub.s32 3, %v3467_v4  ;;  %v656_v37 = vsub.s32 4, %v3467_v4  ;;  %v3111_v38 = vmov 1   ;;  %s3116_s26 = smov 127   ;;  %s3117_s14 = smov 1  }
  0xc1   : > { %v766_v13 = vrot.slane %v3476_v11, %v765_v5  ;;  %v770_v14 = vrot.slane %v3478_v12, %v765_v5  ;;  %v500_v15 = vrot.slane %v3476_v11, %v3471_v6  ;;  %v504_v18 = vrot.slane %v3478_v12, %v3471_v6  ;;  %1444 = vmatprep.mubr.f32.mxu0 %v3101_v1  ;;  %s3119_s9 = smov 2   ;;  %s4350_s22 = smov 4  }
  0xc2   : > { %v508_v19 = vrot.slane %v3485_v16, %v3471_v6  ;;  %v512_v20 = vrot.slane %v3487_v17, %v3471_v6  ;;  %2713 = vset.pattern.permute.xlu1 %v3103_v21  ;;  %v774_v24 = vrot.slane %v3485_v16, %v765_v5  ;;  %v778_v25 = vrot.slane %v3487_v17, %v765_v5  ;;  %s4344_s21 = smov 124   ;;  %s3141_s24 = smov 17  }
  0xc3   : > { %v517_v22 = vcombine.low %v500_v15, %v504_v18  ;;  %1858 = vperm.xlu1 %2713, %v3473_v7   ;;  %v783_v23 = vcombine.low %v766_v13, %v770_v14  ;;  %2714 = vset.pattern.permute.xlu0 %v3104_v26  ;;  %v585_v35 = vrot.slane %v3485_v16, %v3508_v32  ;;  %v3112_v39 = vmov 11   ;;  %s4353_s16 = smov 112   ;;  %s3143_s18 = smov 34  }
  0xc4   : > { %v518_v27 = vcombine.low %v508_v19, %v512_v20  ;;  %v784_v28 = vcombine.low %v774_v24, %v778_v25  ;;  %v589_v36 = vrot.slane %v3487_v17, %v3508_v32  ;;  %v615_v40 = vrot.slane %v3476_v11, %v3513_v34  ;;  %p4377_p10 = scmp.ne.s32.totalorder %s4361_s13, 0 }
  0xc5   : > { %519 = vrot.lane.b32.xlu0 %v517_v22, %s3105_s12  ;;  %v619_v41 = vrot.slane %v3478_v12, %v3513_v34  ;;  %v665_v43 = vrot.slane %v3485_v16, %v656_v37  ;;  %v669_v44 = vrot.slane %v3487_v17, %v656_v37  ;;  %v3113_v45 = vmov 2  }
  0xc6   : > { %v595_v42 = vcombine.low %v585_v35, %v589_v36  ;;  %v623_v47 = vrot.slane %v3485_v16, %v3513_v34  ;;  %v627_v48 = vrot.slane %v3487_v17, %v3513_v34  ;;  %v692_v50 = vsub.s32 5, %v3467_v4 }
  0xc7   : > { %785 = vrot.lane.b32.xlu1 %v783_v23, %s4348_s15  ;;  %v632_v46 = vcombine.low %v615_v40, %v619_v41  ;;  %v675_v49 = vcombine.low %v665_v43, %v669_v44  ;;  %v3115_v51 = vmov 27   ;;  %v3118_v53 = vmov 19  }
  0xc8   : > { %2715 = vset.pattern.permute.xlu1 %v3107_v29  ;;  %v633_v52 = vcombine.low %v623_v47, %v627_v48  ;;  %v693_v54 = vrot.slane %v3476_v11, %v692_v50  ;;  %v697_v55 = vrot.slane %v3478_v12, %v692_v50  ;;  %v728_v56 = vsub.s32 6, %v3467_v4 }
  0xc9   : > { %521 = vrot.lane.b32.xlu0 %v518_v27, %s3105_s12  ;;  %v577_v57 = vrot.slane %v3476_v11, %v3508_v32  ;;  %v581_v58 = vrot.slane %v3478_v12, %v3508_v32  ;;  %v657_v63 = vrot.slane %v3476_v11, %v656_v37  ;;  %v661_v0 = vrot.slane %v3478_v12, %v656_v37 }
  0xca   : > { %v710_v59 = vcombine.low %v693_v54, %v697_v55  ;;  %v729_v60 = vrot.slane %v3476_v11, %v728_v56  ;;  %v733_v61 = vrot.slane %v3478_v12, %v728_v56  ;;  %v3120_v2 = vmov 6  }
  0xcb   : > { %787 = vrot.lane.b32.xlu1 %v784_v28, %s4348_s15  ;;  %v594_v62 = vcombine.low %v577_v57, %v581_v58  ;;  %v674_v3 = vcombine.low %v657_v63, %v661_v0  ;;  %v3554_v5 = vsub.s32 1, %v3467_v4  ;;  %v3122_v8 = vmov 20  }
  0xcc   : > { %v746_v1 = vcombine.low %v729_v60, %v733_v61  ;;  %v3123_v18 = vmov 33   ;;  %v705_v19 = vrot.slane %v3487_v17, %v692_v50  ;;  %v3125_v20 = vmov 15  }
  0xcd   : > { %1890 = vperm.xlu0 %2714, %v3473_v7   ;;  %v539_v9 = vrot.slane %v3476_v11, %v3554_v5  ;;  %v543_v10 = vrot.slane %v3478_v12, %v3554_v5  ;;  %v547_v14 = vrot.slane %v3485_v16, %v3554_v5  ;;  %v551_v15 = vrot.slane %v3487_v17, %v3554_v5 }
  0xce   : > { %v701_v12 = vrot.slane %v3485_v16, %v692_v50  ;;  %v3126_v21 = vmov 9   ;;  %v737_v23 = vrot.slane %v3485_v16, %v728_v56  ;;  %v741_v24 = vrot.slane %v3487_v17, %v728_v56  ;;  %v3608_v50 = vld [vmem:[#allocation2 + $0x10] sm:$0xf] }
  0xcf   : > { %1911 = vperm.xlu1 %2715, %v3473_v7   ;;  %v556_v13 = vcombine.low %v539_v9, %v543_v10  ;;  %v557_v11 = vcombine.low %v547_v14, %v551_v15  ;;  %v3127_v25 = vmov 4   ;;  %v3128_v27 = vmov 13  }
  0xd0   : > { %v711_v22 = vcombine.low %v701_v12, %v705_v19  ;;  %v747_v26 = vcombine.low %v737_v23, %v741_v24  ;;  %v3129_v28 = vmov 22   ;;  %v3130_v16 = vmov 24  }
  0xd1   : > { %2717 = vset.pattern.permute.xlu0 %v3108_v30  ;;  %v3131_v17 = vmov 0   ;;  %v3132_v29 = vmov 3   ;;  %v3135_v35 = vmov 5   ;;  %v3136_v36 = vmov 21  }
  0xd2   : > { %1979 = vperm.xlu0 %2717, %v3473_v7   ;;  %v3137_v37 = vmov 7   ;;  %vm525_vm1 = vcmask 982016   ;;  %v3140_v60 = vmov 839922192   ;;  %vm640_vm2 = vcmask 1039360  }
  0xd3   : > { %2716 = vset.pattern.permute.xlu1 %v3109_v31  ;;  %v3133_v31 = vmov 18   ;;  %v905_v61 = vunpack.c.l.s4 %v3140_v60  ;;  %vm602_vm3 = vcmask 1031168   ;;  %vm564_vm4 = vcmask 1014784  }
  0xd4   : > { %1958 = vperm.xlu1 %2716, %v3473_v7   ;;  %vm527_vm5 = vcmask 1043456   ;;  %vm682_vm6 = vcmask 7168   ;;  %vm718_vm7 = vcmask 15360   ;;  %vm754_vm8 = vcmask 31744  }
  0xd5   : > { %v906_v0 = vunpack.c.0.s8 %v905_v61  ;;  %vm823_vm9 = vcmask 130048   ;;  %vm811_vm10 = vcmask 138240   ;;  %vm836_vm11 = vcmask 121856  }
  0xd6   : > { %2720 = vset.pattern.permute.xlu0 %v3110_v33  ;;  %v3134_v33 = vmov 12   ;;  %vm1178_vm12 = vcmask 277504   ;;  %vm1212_vm13 = vcmask 261120   ;;  %vm1495_vm14 = vcmask 556032  }
  0xd7   : > { %1191 = vperm.xlu0 %2720, %v3473_v7   ;;  %vm1529_vm15 = vcmask 523264  }
  0xd8   : > { %2718 = vset.pattern.permute.xlu1 %v3111_v38  ;;  %v3138_v38 = vmov 14  }
  0xd9   : > { %914 = vperm.xlu1 %2718, %v3473_v7  }
  0xdb   : > { %2721 = vset.pattern.permute.xlu0 %v3112_v39  ;;  %v3139_v39 = vmov 23  }
  0xdc   : > { %1217 = vperm.xlu0 %2721, %v3473_v7  }
  0xdd   : > { %2719 = vset.pattern.permute.xlu1 %v3113_v45 }
  0xde   : > { %939 = vperm.xlu1 %2719, %v3473_v7  }
  0xe0   : > { %598 = vrot.lane.b32.xlu0 %v595_v42, %s4346_s19 }
  0xe1   : > { %2724 = vset.pattern.permute.xlu0 %v3115_v51 }
  0xe2   : > { %634 = vrot.lane.b32.xlu1 %v632_v46, %s3116_s26 }
  0xe3   : > { %2722 = vset.pattern.permute.xlu1 %v3118_v53 }
  0xe4   : > { %678 = vrot.lane.b32.xlu0 %v675_v49, %s3117_s14 }
  0xe6   : > { %636 = vrot.lane.b32.xlu1 %v633_v52, %s3116_s26 }
  0xe8   : > { %1798 = vperm.xlu0 %2724, %v3473_v7  }
  0xea   : > { %1508 = vperm.xlu1 %2722, %v3473_v7  }
  0xec   : > { %712 = vrot.lane.b32.xlu0 %v710_v59, %s3119_s9 }
  0xed   : > { %2725 = vset.pattern.permute.xlu0 %v3120_v2 }
  0xee   : > { %596 = vrot.lane.b32.xlu1 %v594_v62, %s4346_s19  ;;  %s4352_s19 = smov 16  }
  0xef   : > { %2723 = vset.pattern.permute.xlu1 %v3122_v8  ;;  %v762_v8 = vld [vmem:[#allocation2 + $0x14] sm:$0xf] }
  0xf0   : > { %748 = vrot.lane.b32.xlu0 %v746_v1, %s4350_s22 }
  0xf2   : > { %676 = vrot.lane.b32.xlu1 %v674_v3, %s3117_s14 }
  0xf4   : > { %1003 = vperm.xlu0 %2725, %v3473_v7  }
  0xf6   : > { %1534 = vperm.xlu1 %2723, %v3473_v7  }
  0xf8   : > { %2728 = vset.pattern.permute.xlu0 %v3123_v18 }
  0xf9   : > { %1943 = vperm.xlu0 %2728, %v3473_v7  }
  0xfa   : > { %558 = vrot.lane.b32.xlu1 %v556_v13, %s4344_s21  ;;  %v3639_v13 = vsub.s32 %v906_v0, %v3467_v4 }
  0xfb   : > { %2726 = vset.pattern.permute.xlu1 %v3125_v20 }
  0xfd   : > { %2730 = vset.pattern.permute.xlu0 %v3126_v21 }
  0xfe   : > { %1167 = vperm.xlu0 %2730, %v3473_v7   ;;  %560 = vrot.lane.b32.xlu1 %v557_v11, %s4344_s21  ;;  %s3144_s21 = smov 68  }
 0x102   : > { %2733 = vset.pattern.permute.xlu0 %v3127_v25  ;;  %714 = vrot.lane.b32.xlu1 %v711_v22, %s3119_s9 }
 0x103   : > { %977 = vperm.xlu0 %2733, %v3473_v7  }
 0x106   : > { %750 = vrot.lane.b32.xlu1 %v747_v26, %s4350_s22  ;;  %s3150_s22 = smov 64  }
 0x107   : > { %2736 = vset.pattern.permute.xlu0 %v3128_v27 }
 0x108   : > { %1265 = vperm.xlu0 %2736, %v3473_v7  }
 0x10a   : > { %1302 = vperm.xlu1 %2726, %v3473_v7  }
 0x10c   : > { %2739 = vset.pattern.permute.xlu0 %v3129_v28 }
 0x10d   : > { %1582 = vperm.xlu0 %2739, %v3473_v7  }
 0x10e   : > { %2727 = vset.pattern.permute.xlu1 %v3130_v16 }
 0x10f   : > { %1619 = vperm.xlu1 %2727, %v3473_v7  }
 0x111   : > { %2740 = vset.pattern.permute.xlu0 %v3137_v37 }
 0x113   : > { %2729 = vset.pattern.permute.xlu1 %v3131_v17 }
 0x114   : > { %902 = vperm.xlu1 %2729, %v3473_v7  }
 0x118   : > { %2731 = vset.pattern.permute.xlu1 %v3132_v29 }
 0x119   : > { %964 = vperm.xlu1 %2731, %v3473_v7  }
 0x11d   : > { %2732 = vset.pattern.permute.xlu1 %v3133_v31 }
 0x11e   : > { %1484 = vperm.xlu1 %2732, %v3473_v7  }
 0x122   : > { %2734 = vset.pattern.permute.xlu1 %v3134_v33 }
 0x123   : > { %1243 = vperm.xlu1 %2734, %v3473_v7  }
 0x127   : > { %2735 = vset.pattern.permute.xlu1 %v3135_v35 }
 0x128   : > { %990 = vperm.xlu1 %2735, %v3473_v7  }
 0x12c   : > { %2737 = vset.pattern.permute.xlu1 %v3136_v36 }
 0x12d   : > { %1560 = vperm.xlu1 %2737, %v3473_v7  }
 0x131   : > { %2738 = vset.pattern.permute.xlu1 %v3138_v38 }
 0x132   : > { %1278 = vperm.xlu1 %2738, %v3473_v7  }
 0x136   : > { %2741 = vset.pattern.permute.xlu1 %v3139_v39 }
 0x13d   : > { %v3590_v40 = vpop.permute.xlu1 %1832 }
 0x13e   : > { %v3592_v41 = vpop.permute.xlu0 %1811 }
 0x142   : > { %v3594_v42 = vpop.permute.xlu1 %1858  ;;  %v3596_v43 = vpop.permute.xlu0 %519 }
 0x143   : > { %v523_v44 = vrot.slane %v3596_v43, 4 }
 0x145   : > { %v526_v45 = vsel %vm525_vm1, %v523_v44, %v3596_v43 }
 0x146   : > { %v3603_v46 = vpop.permute.xlu1 %785  ;;  %v3605_v47 = vpop.permute.xlu0 %521  ;;  %v533_v48 = vmul.f32 0.0, %v526_v45 }
 0x147   : > { %v524_v49 = vrot.slane %v3605_v47, 4 }
 0x148   : > { %1862 = vrot.lane.b32.xlu1 %v533_v48, %s4348_s15 }
 0x149   : > { %v535_v51 = vmul.f32 %v524_v49, %v3608_v50 }
 0x14a   : > { %v3614_v52 = vpop.permute.xlu1 %787 }
 0x14b   : > { %v790_v14 = vrot.slane %v3614_v52, 4 }
 0x14c   : > { %v3616_v53 = vpop.permute.xlu0 %1890 }
 0x14d   : > { %v799_v18 = vmul.f32 %v790_v14, %v762_v8 }
 0x14e   : > { %v3618_v54 = vpop.permute.xlu1 %1911 }
 0x151   : > { %v1980_v55 = vpop.permute.xlu0 %1979 }
 0x152   : > { %v3646_v11 = vrot.slane %v1980_v55, %v3639_v13 }
 0x153   : > { %v3620_v56 = vpop.permute.xlu1 %1958 }
 0x154   : > { %v1990_v21 = vmul.f32 %v3646_v11, %v799_v18 }
 0x156   : > { %v3622_v57 = vpop.permute.xlu0 %1191 }
 0x158   : > { %v3624_v58 = vpop.permute.xlu1 %914 }
 0x15b   : > { %v3626_v59 = vpop.permute.xlu0 %1217 }
 0x15d   : > { %v3628_v62 = vpop.permute.xlu1 %939 }
 0x15f   : > { %v3630_v63 = vpop.permute.xlu0 %598 }
 0x160   : > { %v601_v1 = vrot.slane %v3630_v63, 4 }
 0x161   : > { %v635_v2 = vpop.permute.xlu1 %634 }
 0x162   : > { %v611_v3 = vmul.f32 %v601_v1, %v3608_v50  ;;  %v638_v9 = vrot.slane %v635_v2, 4 }
 0x163   : > { %v3636_v10 = vpop.permute.xlu0 %678 }
 0x164   : > { %v641_v15 = vsel %vm640_vm2, %v638_v9, %v635_v2 }
 0x165   : > { %v3648_v12 = vpop.permute.xlu1 %636  ;;  %v647_v19 = vmul.f32 0.0, %v641_v15 }
 0x166   : > { %v639_v18 = vrot.slane %v3648_v12, 4 }
 0x167   : > { %v1799_v20 = vpop.permute.xlu0 %1798  ;;  %804 = vrot.lane.b32.xlu0 %v647_v19, %s3141_s24 }
 0x168   : > { %v1806_v4 = vrot.slane %v1799_v20, %v3639_v13 }
 0x169   : > { %v3653_v22 = vpop.permute.xlu1 %1508 }
 0x16a   : > { %v3655_v23 = vmul.f32 %v1806_v4, %v533_v48 }
 0x16b   : > { %v3657_v24 = vpop.permute.xlu0 %712  ;;  %1995 = vrot.lane.b32.xlu0 %v1990_v21, %s4353_s16 }
 0x16d   : > { %v597_v25 = vpop.permute.xlu1 %596 }
 0x16e   : > { %v600_v26 = vrot.slane %v597_v25, 4 }
 0x16f   : > { %v3660_v27 = vpop.permute.xlu0 %748 }
 0x170   : > { %v603_v28 = vsel %vm602_vm3, %v600_v26, %v597_v25  ;;  %v528_v25 = vsel %vm527_vm5, %v523_v44, %v524_v49 }
 0x171   : > { %v3663_v16 = vmul.f32 0.0, %v603_v28  ;;  %v3665_v17 = vpop.permute.xlu1 %676  ;;  %v604_v28 = vsel %vm527_vm5, %v600_v26, %v601_v1 }
 0x172   : > { %v605_v44 = vsel %vm602_vm3, %v604_v28, %v3630_v63  ;;  %v922_v28 = vrot.slane %v3624_v58, %v3639_v13  ;;  %v1966_v58 = vrot.slane %v3620_v56, %v3639_v13 }
 0x173   : > { %1171 = vrot.lane.b32.xlu1 %v3663_v16, %s3143_s18  ;;  %v3669_v29 = vpop.permute.xlu0 %1003 }
 0x175   : > { %v3671_v31 = vpop.permute.xlu1 %1534 }
 0x177   : > { %840 = vrot.lane.b32.xlu1 %v647_v19, %s3117_s14 }
 0x178   : > { %v1944_v33 = vpop.permute.xlu0 %1943 }
 0x179   : > { %v1951_v35 = vrot.slane %v1944_v33, %v3639_v13  ;;  %v559_v36 = vpop.permute.xlu1 %558 }
 0x17a   : > { %v562_v37 = vrot.slane %v559_v36, 4 }
 0x17b   : > { %v3675_v38 = vmul.f32 %v1951_v35, %v535_v51 }
 0x17c   : > { %v565_v39 = vsel %vm564_vm4, %v562_v37, %v559_v36 }
 0x17d   : > { %v561_v45 = vpop.permute.xlu1 %560  ;;  %v3678_v48 = vmul.f32 0.0, %v565_v39 }
 0x17e   : > { %v563_v55 = vrot.slane %v561_v45, 4 }
 0x17f   : > { %1488 = vrot.lane.b32.xlu1 %v3678_v48, %s3144_s21 }
 0x180   : > { %v573_v60 = vmul.f32 %v563_v55, %v3608_v50  ;;  %v566_v20 = vsel %vm527_vm5, %v562_v37, %v563_v55  ;;  %v529_v55 = vsel %vm525_vm1, %v528_v25, %v3605_v47 }
 0x181   : > { %v3683_v61 = vpop.permute.xlu1 %714  ;;  %v567_v36 = vsel %vm564_vm4, %v566_v20, %v561_v45 }
 0x185   : > { %v3685_v0 = vpop.permute.xlu1 %750 }
 0x189   : > { %v1303_v2 = vpop.permute.xlu1 %1302 }
 0x18a   : > { %v3688_v51 = vrot.slane %v1303_v2, %v3639_v13 }
 0x18c   : > { %v3691_v8 = vmul.f32 %v3688_v51, %v611_v3  ;;  %v642_v3 = vsel %vm527_vm5, %v638_v9, %v639_v18 }
 0x18d   : > { %v643_v43 = vsel %vm640_vm2, %v642_v3, %v3648_v12  ;;  %v1819_v3 = vrot.slane %v3592_v41, %v3639_v13 }
 0x18e   : > { %v1620_v15 = vpop.permute.xlu1 %1619 }
 0x18f   : > { %v3695_v19 = vrot.slane %v1620_v15, %v3639_v13  ;;  %v789_v15 = vrot.slane %v3603_v46, 4 }
 0x191   : > { %v3699_v21 = vmul.f32 %v3695_v19, %v573_v60  ;;  %v792_v63 = vsel %vm527_vm5, %v789_v15, %v790_v14  ;;  %v680_v14 = vrot.slane %v3665_v17, 4 }
 0x193   : > { %v478_v33 = vpop.f32.mrb[0].mxu0 }
 0x194   : > { %v480_v37 = vpop.f32.mrb[1].mxu0 }
 0x195   : > { %v487_v39 = vcombine.low %v478_v33, %v480_v37  ;;  %v3147_v33 = vmov 8   ;;  %v3148_v37 = vmov 16  }
 0x197   : > { %489 = vst [vmem:[#allocation2 + $0x8] sm:$0xff] %v487_v39  ;;  %v3719_v49 = vmul.f32 %v605_v44, %v487_v39  ;;  %v3721_v9 = vmul.f32 %v567_v36, %v487_v39  ;;  %v534_v1 = vmul.f32 %v529_v55, %v487_v39  ;;  %v3723_v26 = vmul.f32 %v643_v43, %v487_v39 }
 0x198   : > { %v1516_v44 = vrot.slane %v3653_v22, %v3639_v13 }
 0x199   : > { %v3725_v45 = vmul.f32 %v1806_v4, %v534_v1  ;;  %v3727_v60 = vmul.f32 %v1951_v35, %v534_v1  ;;  %v791_v4 = vsel %vm408_vm0, %v789_v15, %v3603_v46  ;;  %v793_v35 = vsel %vm408_vm0, %v792_v63, %v3614_v52 }
 0x19a   : > { %v683_v46 = vsel %vm682_vm6, %v680_v14, %v3665_v17  ;;  %v681_v17 = vrot.slane %v3636_v10, 4 }
 0x19c   : > { %v684_v39 = vsel %vm527_vm5, %v680_v14, %v681_v17  ;;  %v3829_v17 = vpop.permute.xlu1 %902 }
 0x19d   : > { %v685_v43 = vsel %vm682_vm6, %v684_v39, %v3636_v10  ;;  %v1840_v10 = vrot.slane %v3590_v40, %v3639_v13  ;;  %v717_v40 = vrot.slane %v3683_v61, 4  ;;  %v1898_v39 = vrot.slane %v3616_v53, %v3639_v13 }
 0x19e   : > { %v3729_v2 = vld [vmem:[#allocation2 + $0xc] sm:$0xff]  ;;  %v3731_v47 = vld [vmem:[#allocation2 + $0x4] sm:$0xff] }
 0x19f   : > { %818 = vrot.lane.b32.xlu1 %v3729_v2, %s4352_s19  ;;  %816 = vrot.lane.b32.xlu0 %v3731_v47, %s4352_s19  ;;  %v798_v20 = vmul.f32 %v793_v35, %v3729_v2  ;;  %v797_v25 = vmul.f32 %v791_v4, %v3731_v47  ;;  %v3759_v52 = vmul.f32 %v683_v46, %v3731_v47  ;;  %v716_v35 = vrot.slane %v3657_v24, 4 }
 0x1a0   : > { %v924_v36 = vmul.f32 %v922_v28, %v3731_v47  ;;  %v1821_v41 = vmul.f32 %v1819_v3, %v3731_v47  ;;  %v1968_v55 = vmul.f32 %v1966_v58, %v3729_v2  ;;  %v3784_v56 = vmul.f32 %v685_v43, %v3729_v2 }
 0x1a1   : > { %v925_v15 = vmul.f32 %v922_v28, %v3729_v2  ;;  %v1842_v22 = vmul.f32 %v1840_v10, %v797_v25  ;;  %v1843_v63 = vmul.f32 %v1840_v10, %v798_v20  ;;  %v1989_v14 = vmul.f32 %v3646_v11, %v798_v20 }
 0x1a2   : > { %v947_v46 = vrot.slane %v3628_v62, %v3639_v13  ;;  %v720_v3 = vsel %vm527_vm5, %v716_v35, %v717_v40  ;;  %v1225_v28 = vrot.slane %v3626_v59, %v3639_v13  ;;  %v1518_v11 = vmul.f32 %v1516_v44, %v3731_v47  ;;  %v3883_v40 = vpop.permute.xlu0 %1167 }
 0x1a3   : > { %1595 = vperm.xlu1 %2741, %v3473_v7   ;;  %1864 = vrot.lane.b32.xlu0 %v534_v1, %s4348_s15  ;;  %s3146_s15 = smov 15   ;;  %v1519_v1 = vmul.f32 %v1516_v44, %v3729_v2  ;;  %v721_v62 = vsel %vm718_vm7, %v720_v3, %v3683_v61  ;;  %v850_v58 = vrot.slane %v3731_v47, 4  ;;  %v851_v61 = vrot.slane %v3729_v2, 4 }
 0x1a7   : > { %1917 = vrot.lane.b32.xlu1 %v798_v20, %s3105_s12  ;;  %1915 = vrot.lane.b32.xlu0 %v797_v25, %s3105_s12  ;;  %v719_v25 = vsel %vm718_vm7, %v716_v35, %v3657_v24  ;;  %v752_v24 = vrot.slane %v3660_v27, 4  ;;  %v3153_v35 = vmov 17  }
 0x1a8   : > { %2742 = vset.pattern.permute.xlu1 %v3147_v33  ;;  %v3823_v20 = vmul.f32 %v719_v25, %v3731_v47  ;;  %v753_v33 = vrot.slane %v3685_v0, 4  ;;  %v3895_v25 = vrot.slane %v3669_v29, %v3639_v13 }
 0x1aa   : > { %v1227_v59 = vmul.f32 %v1225_v28, %v3823_v20 }
 0x1ab   : > { %806 = vrot.lane.b32.xlu1 %v3723_v26, %s3141_s24  ;;  %1245 = vrot.lane.b32.xlu0 %v3663_v16, %s3119_s9  ;;  %v1199_v16 = vrot.slane %v3622_v57, %v3639_v13  ;;  %s3149_s24 = smov 32  }
 0x1ad   : > { %v1201_v57 = vmul.f32 %v1199_v16, %v3731_v47  ;;  %v1202_v4 = vmul.f32 %v1199_v16, %v3729_v2  ;;  %v949_v16 = vmul.f32 %v947_v46, %v3759_v52 }
 0x1af   : > { %829 = vrot.lane.b32.xlu1 %v3759_v52, %s3146_s15  ;;  %1028 = vperm.xlu0 %2740, %v3473_v7  }
 0x1b3   : > { %928 = vrot.lane.b32.xlu1 %v924_v36, %s4352_s19  ;;  %1823 = vrot.lane.b32.xlu0 %v1821_v41, %s3105_s12  ;;  %v3835_v36 = vmul.f32 %v721_v62, %v3729_v2  ;;  %v755_v41 = vsel %vm754_vm8, %v752_v24, %v3660_v27  ;;  %v950_v27 = vmul.f32 %v947_v46, %v3784_v56  ;;  %v3897_v46 = vpop.permute.xlu0 %977 }
 0x1b4   : > { %2743 = vset.pattern.permute.xlu0 %v3148_v37  ;;  %v756_v37 = vsel %vm527_vm5, %v752_v24, %v753_v33  ;;  %v3851_v43 = vmul.f32 %v755_v41, %v3731_v47 }
 0x1b5   : > { %v757_v44 = vsel %vm754_vm8, %v756_v37, %v3685_v0 }
 0x1b6   : > { %v3862_v53 = vmul.f32 %v757_v44, %v3729_v2 }
 0x1b7   : > { %1205 = vrot.lane.b32.xlu1 %v1201_v57, %s3149_s24  ;;  %1970 = vrot.lane.b32.xlu0 %v1968_v55, %s3105_s12  ;;  %v3846_v57 = vpop.permute.xlu1 %964  ;;  %v1228_v55 = vmul.f32 %v1225_v28, %v3835_v36 }
 0x1bb   : > { %1247 = vrot.lane.b32.xlu1 %v3719_v49, %s3119_s9  ;;  %831 = vrot.lane.b32.xlu0 %v3784_v56, %s3146_s15  ;;  %s4372_s9 = smov 4  }
 0x1bf   : > { %1524 = vrot.lane.b32.xlu1 %v1519_v1, %s3150_s22  ;;  %930 = vrot.lane.b32.xlu0 %v925_v15, %s4352_s19  ;;  %v3856_v1 = vsel %vm527_vm5, %v850_v58, %v851_v61  ;;  %v1542_v15 = vrot.slane %v3671_v31, %v3639_v13  ;;  %s3157_s19 = smov 96  }
 0x1c1   : > { %v1544_v10 = vmul.f32 %v1542_v15, %v3851_v43  ;;  %v1545_v0 = vmul.f32 %v1542_v15, %v3862_v53 }
 0x1c3   : > { %855 = vrot.lane.b32.xlu1 %v3759_v52, %s3116_s26  ;;  %1173 = vrot.lane.b32.xlu0 %v3719_v49, %s3143_s18  ;;  %s3154_s18 = smov 113  }
 0x1c7   : > { %1846 = vrot.lane.b32.xlu1 %v1842_v22, %s4353_s16  ;;  %842 = vrot.lane.b32.xlu0 %v3723_v26, %s3117_s14  ;;  %s3151_s14 = smov 30   ;;  %v1900_v22 = vmul.f32 %v1898_v39, %v3856_v1 }
 0x1cb   : > { %1848 = vrot.lane.b32.xlu1 %v1843_v63, %s4353_s16  ;;  %1207 = vrot.lane.b32.xlu0 %v1202_v4, %s3149_s24  ;;  %v3866_v63 = vpop.permute.xlu1 %1484  ;;  %s4374_s24 = smov 124  }
 0x1cf   : > { %1993 = vrot.lane.b32.xlu1 %v1989_v14, %s4353_s16  ;;  %1490 = vrot.lane.b32.xlu0 %v3721_v9, %s3144_s21  ;;  %v3874_v31 = vpop.permute.xlu1 %1243 }
 0x1d3   : > { %953 = vrot.lane.b32.xlu1 %v949_v16, %s3146_s15  ;;  %1522 = vrot.lane.b32.xlu0 %v1518_v11, %s3150_s22  ;;  %v3878_v4 = vpop.permute.xlu1 %990 }
 0x1d7   : > { %1231 = vrot.lane.b32.xlu1 %v1227_v59, %s3151_s14  ;;  %857 = vrot.lane.b32.xlu0 %v3784_v56, %s3116_s26  ;;  %s3152_s26 = smov 60   ;;  %v3885_v14 = vpop.permute.xlu1 %1560 }
 0x1db   : > { %1233 = vrot.lane.b32.xlu1 %v1228_v55, %s3151_s14  ;;  %955 = vrot.lane.b32.xlu0 %v950_v27, %s3146_s15  ;;  %s4373_s15 = smov 126   ;;  %v3899_v3 = vpop.permute.xlu1 %1278  ;;  %s3155_s14 = smov 111  }
 0x1df   : > { %1548 = vrot.lane.b32.xlu1 %v1544_v10, %s3152_s26  ;;  %1902 = vrot.lane.b32.xlu0 %v1900_v22, %s3105_s12  ;;  %v1863_v12 = vpop.permute.xlu1 %1862 }
 0x1e0   : > { %v1866_v37 = vrot.slane %v1863_v12, 4 }
 0x1e3   : > { %1562 = vrot.lane.b32.xlu1 %v3678_v48, %s4372_s9  ;;  %1550 = vrot.lane.b32.xlu0 %v1545_v0, %s3152_s26  ;;  %v3891_v48 = vmul.f32 %v639_v18, %v3608_v50  ;;  %v3907_v50 = vpop.permute.xlu0 %1265  ;;  %v1930_v0 = vrot.slane %v3618_v54, %v3639_v13 }
 0x1e5   : > { %v1014_v28 = vmul.f32 %v3895_v25, %v3891_v48  ;;  %v3913_v18 = vpop.permute.xlu1 %1171 }
 0x1e7   : > { %1564 = vrot.lane.b32.xlu0 %v3721_v9, %s4372_s9  ;;  %v3911_v29 = vpop.permute.xlu0 %1582  ;;  %s3156_s9 = smov 98  }
 0x1e9   : > { %v3920_v11 = vpop.permute.xlu1 %840 }
 0x1eb   : > { %1328 = vperm.xlu0 %2743, %v3473_v7   ;;  %v805_v16 = vpop.permute.xlu0 %804 }
 0x1ef   : > { %1282 = vrot.lane.b32.xlu0 %v3823_v20, %s4373_s15  ;;  %v3924_v24 = vpop.permute.xlu0 %1995 }
 0x1f0   : > { %2744 = vset.pattern.permute.xlu0 %v3153_v35 }
 0x1f1   : > { %v3926_v62 = vpop.permute.xlu1 %1488 }
 0x1f3   : > { %1351 = vperm.xlu0 %2744, %v3473_v7  }
 0x1f7   : > { %879 = vrot.lane.b32.xlu0 %v3729_v2, %s4353_s16  ;;  %s3158_s16 = smov 94  }
 0x1f8   : > { %2747 = vset.pattern.permute.xlu0 %v3108_v30  ;;  %v1312_v30 = vmul.f32 %v3688_v51, %v3719_v49  ;;  %v1629_v51 = vmul.f32 %v3695_v19, %v3721_v9  ;;  %v1877_v19 = vrot.slane %v3594_v42, %v3639_v13 }
 0x1fb   : > { %1019 = vrot.lane.b32.xlu0 %v1014_v28, %s3154_s18 }
 0x1ff   : > { %1601 = vrot.lane.b32.xlu0 %v3862_v53, %s4374_s24 }
 0x203   : > { %888 = vrot.lane.b32.xlu0 %v3759_v52, %s3155_s14 }
 0x207   : > { %1316 = vrot.lane.b32.xlu0 %v1312_v30, %s3156_s9  ;;  %v808_v30 = vrot.slane %v805_v16, 4 }
 0x20b   : > { %1330 = vrot.lane.b32.xlu0 %v3731_v47, %s3157_s19 }
 0x20f   : > { %1353 = vrot.lane.b32.xlu0 %v3823_v20, %s3158_s16 }
 0x211   : > { %v819_v49 = vpop.permute.xlu1 %818  ;;  %v817_v52 = vpop.permute.xlu0 %816 }
 0x212   : > { %v821_v33 = vrot.slane %v819_v49, 4  ;;  %v820_v59 = vrot.slane %v817_v52, 4 }
 0x213   : > { %1633 = vrot.lane.b32.xlu0 %v1629_v51, %s3144_s21 }
 0x214   : > { %v822_v41 = vsel %vm527_vm5, %v820_v59, %v821_v33 }
 0x215   : > { %v824_v58 = vsel %vm823_vm9, %v817_v52, %v822_v41  ;;  %v1865_v61 = vpop.permute.xlu0 %1864  ;;  %v910_v52 = vrot.slane %v3829_v17, %v3639_v13 }
 0x216   : > { %v1867_v39 = vrot.slane %v1865_v61, 4 }
 0x217   : > { %1646 = vrot.lane.b32.xlu0 %v3731_v47, %s3150_s22 }
 0x218   : > { %v1868_v9 = vsel %vm527_vm5, %v1866_v37, %v1867_v39 }
 0x219   : > { %v1869_v20 = vsel %vm408_vm0, %v1868_v9, %v1865_v61  ;;  %v1916_v44 = vpop.permute.xlu0 %1915  ;;  %v3159_v9 = vmov 25  }
 0x21a   : > { %v1879_v55 = vmul.f32 %v1877_v19, %v1869_v20  ;;  %v1919_v10 = vrot.slane %v1916_v44, 4 }
 0x21b   : > { %1668 = vrot.lane.b32.xlu0 %v3851_v43, %s3152_s26 }
 0x21c   : > { %1881 = vrot.lane.b32.xlu1 %v1879_v55, %s3105_s12 }
 0x21d   : > { %v1246_v35 = vpop.permute.xlu0 %1245 }
 0x222   : > { %v3944_v27 = vpop.permute.xlu1 %1595 }
 0x226   : > { %v1918_v15 = vpop.permute.xlu1 %1917 }
 0x227   : > { %v1920_v22 = vrot.slane %v1918_v15, 4 }
 0x229   : > { %v1921_v42 = vsel %vm527_vm5, %v1919_v10, %v1920_v22  ;;  %v1260_v22 = vrot.slane %v3874_v31, %v3639_v13 }
 0x22a   : > { %v1922_v28 = vsel %vm525_vm1, %v1921_v42, %v1918_v15  ;;  %v807_v12 = vpop.permute.xlu1 %806 }
 0x22b   : > { %v1932_v51 = vmul.f32 %v1930_v0, %v1922_v28  ;;  %v809_v49 = vrot.slane %v807_v12, 4 }
 0x22d   : > { %v810_v33 = vsel %vm527_vm5, %v808_v30, %v809_v49  ;;  %1934 = vrot.lane.b32.xlu1 %v1932_v51, %s3105_s12  ;;  %s4375_s12 = smov 112  }
 0x22e   : > { %v812_v59 = vsel %vm811_vm10, %v810_v33, %v807_v12  ;;  %v830_v41 = vpop.permute.xlu1 %829  ;;  %v3954_v54 = vpop.permute.xlu0 %1028  ;;  %vm884_vm10 = vcmask 916480  }
 0x22f   : > { %v826_v61 = vadd.f32 %v824_v58, %v812_v59  ;;  %v912_v37 = vmul.f32 %v910_v52, %v812_v59  ;;  %v1249_v58 = vrot.slane %v1246_v35, 4  ;;  %v833_v44 = vrot.slane %v830_v41, 4 }
 0x231   : > { %1041 = vperm.xlu1 %2742, %v3473_v7  }
 0x232   : > { %v929_v39 = vpop.permute.xlu1 %928  ;;  %v3957_v16 = vpop.permute.xlu0 %1823 }
 0x233   : > { %v932_v35 = vrot.slane %v929_v39, 4 }
 0x235   : > { %866 = vrot.lane.b32.xlu1 %v3723_v26, %s3154_s18 }
 0x236   : > { %v1206_v19 = vpop.permute.xlu1 %1205  ;;  %v3961_v17 = vpop.permute.xlu0 %1970  ;;  %2745 = vset.pattern.permute.xlu1 %v3159_v9 }
 0x239   : > { %868 = vrot.lane.b32.xlu1 %v3891_v48, %s3154_s18 }
 0x23a   : > { %v1248_v20 = vpop.permute.xlu1 %1247  ;;  %v832_v55 = vpop.permute.xlu0 %831 }
 0x23b   : > { %v1250_v15 = vrot.slane %v1248_v20, 4  ;;  %v834_v10 = vrot.slane %v832_v55, 4 }
 0x23d   : > { %v1251_v0 = vsel %vm527_vm5, %v1249_v58, %v1250_v15  ;;  %v835_v42 = vsel %vm527_vm5, %v833_v44, %v834_v10  ;;  %1284 = vrot.lane.b32.xlu1 %v3835_v36, %s4373_s15  ;;  %v3160_v15 = vmov 26   ;;  %v844_v10 = vrot.slane %v3920_v11, 4 }
 0x23e   : > { %v1252_v28 = vsel %vm718_vm7, %v1251_v0, %v1248_v20  ;;  %v1525_v48 = vpop.permute.xlu1 %1524  ;;  %v931_v12 = vpop.permute.xlu0 %930  ;;  %v837_v30 = vsel %vm836_vm11, %v830_v41, %v835_v42  ;;  %v1175_v20 = vrot.slane %v3913_v18, 4  ;;  %v1187_v41 = vrot.slane %v3883_v40, %v3639_v13 }
 0x23f   : > { %v3973_v51 = vmul.f32 %v1260_v22, %v1252_v28  ;;  %v933_v49 = vrot.slane %v931_v12, 4  ;;  %v839_v52 = vadd.f32 %v837_v30, %v826_v61  ;;  %v1013_v22 = vmul.f32 %v3895_v25, %v3723_v26 }
 0x240   : > { %v972_v40 = vrot.slane %v3846_v57, %v3639_v13  ;;  %v1209_v12 = vrot.slane %v1206_v19, 4  ;;  %vm1238_vm7 = vcmask 244736  }
 0x241   : > { %v934_v31 = vsel %vm527_vm5, %v932_v35, %v933_v49  ;;  %1644 = vperm.xlu1 %2745, %v3473_v7  }
 0x242   : > { %v935_v33 = vsel %vm823_vm9, %v929_v39, %v934_v31  ;;  %v856_v59 = vpop.permute.xlu1 %855  ;;  %v1174_v9 = vpop.permute.xlu0 %1173  ;;  %v1492_v31 = vrot.slane %v3926_v62, 4 }
 0x243   : > { %v3979_v55 = vadd.f32 %v935_v33, %v912_v37  ;;  %v1176_v58 = vrot.slane %v1174_v9, 4 }
 0x245   : > { %v1177_v44 = vsel %vm527_vm5, %v1175_v20, %v1176_v58  ;;  %877 = vrot.lane.b32.xlu1 %v3731_v47, %s4375_s12  ;;  %v1504_v20 = vrot.slane %v3866_v63, %v3639_v13  ;;  %v2780_v58 = vld [vmem:[#allocation9] sm:$0xf]  ;;  %s3161_s12 = smov [#allocation15]  }
 0x246   : > { %v1179_v61 = vsel %vm1178_vm12, %v1177_v44, %v1174_v9  ;;  %v3986_v7 = vpop.permute.xlu1 %1846  ;;  %v843_v39 = vpop.permute.xlu0 %842  ;;  %2746 = vset.pattern.permute.xlu1 %v3160_v15  ;;  %vm1360_vm12 = vcmask 769024  }
 0x247   : > { %v1189_v18 = vmul.f32 %v1187_v41, %v1179_v61  ;;  %v845_v37 = vrot.slane %v843_v39, 4 }
 0x249   : > { %v846_v0 = vsel %vm527_vm5, %v844_v10, %v845_v37  ;;  %1017 = vrot.lane.b32.xlu1 %v1013_v22, %s3154_s18 }
 0x24a   : > { %v847_v47 = vsel %vm682_vm6, %v846_v0, %v843_v39  ;;  %v3996_v42 = vpop.permute.xlu1 %1848  ;;  %v1208_v28 = vpop.permute.xlu0 %1207 }
 0x24b   : > { %v849_v11 = vadd.f32 %v847_v47, %v839_v52  ;;  %v974_v30 = vmul.f32 %v972_v40, %v847_v47  ;;  %v1210_v35 = vrot.slane %v1208_v28, 4  ;;  %v998_v40 = vrot.slane %v3878_v4, %v3639_v13 }
 0x24c   : > { %v985_v4 = vrot.slane %v3897_v46, %v3639_v13 }
 0x24d   : > { %v1211_v49 = vsel %vm527_vm5, %v1209_v12, %v1210_v35  ;;  %1599 = vrot.lane.b32.xlu1 %v3851_v43, %s4374_s24 }
 0x24e   : > { %v1213_v26 = vsel %vm1212_vm13, %v1206_v19, %v1211_v49  ;;  %v4001_v57 = vpop.permute.xlu1 %1993  ;;  %v1491_v25 = vpop.permute.xlu0 %1490  ;;  %v1527_v19 = vrot.slane %v1525_v48, 4  ;;  %v854_v48 = vadd.f32 %v3856_v1, %v849_v11  ;;  %v1273_v11 = vrot.slane %v3907_v50, %v3639_v13 }
 0x24f   : > { %v1215_v33 = vadd.f32 %v1213_v26, %v1189_v18  ;;  %v1493_v9 = vrot.slane %v1491_v25, 4  ;;  %v859_v18 = vrot.slane %v856_v59, 4  ;;  %v987_v46 = vmul.f32 %v985_v4, %v3856_v1 }
 0x251   : > { %v1494_v52 = vsel %vm527_vm5, %v1492_v31, %v1493_v9  ;;  %1666 = vperm.xlu1 %2746, %v2780_v58  }
 0x252   : > { %v1496_v41 = vsel %vm1495_vm14, %v1494_v52, %v1491_v25  ;;  %v954_v44 = vpop.permute.xlu1 %953  ;;  %v1523_v43 = vpop.permute.xlu0 %1522 }
 0x253   : > { %v1506_v61 = vmul.f32 %v1504_v20, %v1496_v41  ;;  %v1526_v39 = vrot.slane %v1523_v43, 4  ;;  %v957_v47 = vrot.slane %v954_v44, 4 }
 0x255   : > { %v1528_v62 = vsel %vm527_vm5, %v1526_v39, %v1527_v19  ;;  %890 = vrot.lane.b32.xlu1 %v3784_v56, %s3155_s14  ;;  %v1275_v19 = vmul.f32 %v1273_v11, %v3856_v1 }
 0x256   : > { %v1530_v15 = vsel %vm1529_vm15, %v1523_v43, %v1528_v62  ;;  %v1232_v63 = vpop.permute.xlu1 %1231  ;;  %v858_v10 = vpop.permute.xlu0 %857 }
 0x257   : > { %v1532_v37 = vadd.f32 %v1530_v15, %v1506_v61  ;;  %v860_v22 = vrot.slane %v858_v10, 4  ;;  %v1235_v28 = vrot.slane %v1232_v63, 4 }
 0x259   : > { %v861_v0 = vsel %vm527_vm5, %v859_v18, %v860_v22  ;;  %1318 = vrot.lane.b32.xlu1 %v3691_v8, %s3156_s9 }
 0x25a   : > { %v862_v56 = vsel %vm640_vm2, %v861_v0, %v858_v10  ;;  %v1234_v12 = vpop.permute.xlu1 %1233  ;;  %v956_v35 = vpop.permute.xlu0 %955  ;;  %vm1555_vm2 = vcmask 490496  }
 0x25b   : > { %v4019_v59 = vadd.f32 %v862_v56, %v854_v48  ;;  %v1000_v49 = vmul.f32 %v998_v40, %v862_v56  ;;  %v1236_v26 = vrot.slane %v1234_v12, 4  ;;  %v958_v25 = vrot.slane %v956_v35, 4 }
 0x25c   : > { %v1577_v40 = vrot.slane %v3885_v14, %v3639_v13 }
 0x25d   : > { %v1237_v8 = vsel %vm527_vm5, %v1235_v28, %v1236_v26  ;;  %v959_v31 = vsel %vm527_vm5, %v957_v47, %v958_v25  ;;  %1332 = vrot.lane.b32.xlu1 %v3729_v2, %s3157_s19  ;;  %v1825_v28 = vrot.slane %v3957_v16, 4  ;;  %s4376_s19 = smov 8  }
 0x25e   : > { %v1239_v9 = vsel %vm1238_vm7, %v1232_v63, %v1237_v8  ;;  %v960_v20 = vsel %vm836_vm11, %v954_v44, %v959_v31  ;;  %v1549_v52 = vpop.permute.xlu1 %1548  ;;  %v1903_v58 = vpop.permute.xlu0 %1902  ;;  %vm1337_vm11 = vcmask 785408  }
 0x25f   : > { %v1241_v41 = vadd.f32 %v1239_v9, %v1215_v33  ;;  %v962_v43 = vadd.f32 %v960_v20, %v3979_v55  ;;  %v1552_v62 = vrot.slane %v1549_v52, 4  ;;  %v1826_v14 = vsel %vm525_vm1, %v1825_v28, %v3957_v16 }
 0x260   : > { %v1830_v35 = vadd.f32 %v1825_v28, %v3725_v45  ;;  %v1904_v11 = vrot.slane %v1903_v58, 4  ;;  %v1972_v45 = vrot.slane %v3961_v17, 4 }
 0x261   : > { %1355 = vrot.lane.b32.xlu1 %v3835_v36, %s3158_s16  ;;  %v1263_v50 = vadd.f32 %v3973_v51, %v1241_v41  ;;  %v975_v61 = vadd.f32 %v974_v30, %v962_v43  ;;  %v1997_v43 = vrot.slane %v4001_v57, 4 }
 0x262   : > { %v1551_v39 = vpop.permute.xlu0 %1550  ;;  %v1563_v33 = vpop.permute.xlu1 %1562  ;;  %v1905_v16 = vsel %vm525_vm1, %v1904_v11, %v1903_v58  ;;  %v1973_v58 = vsel %vm525_vm1, %v1972_v45, %v3961_v17 }
 0x263   : > { %v1553_v15 = vrot.slane %v1551_v39, 4  ;;  %v4036_v44 = vadd.f32 %v1275_v19, %v1263_v50  ;;  %v988_v63 = vadd.f32 %v987_v46, %v975_v61  ;;  %v1566_v51 = vrot.slane %v1563_v33, 4 }
 0x264   : > { %v1999_v39 = vsel %vm884_vm10, %v1997_v43, %v3924_v24 }
 0x265   : > { %v1554_v55 = vsel %vm527_vm5, %v1552_v62, %v1553_v15  ;;  %1635 = vrot.lane.b32.xlu1 %v3699_v21, %s3144_s21  ;;  %v4041_v10 = vadd.f32 %v1000_v49, %v988_v63  ;;  %v1829_v49 = vadd.f32 %v1826_v14, %v3655_v23  ;;  %v1998_v15 = vsel %vm884_vm10, %v1997_v43, %v4001_v57 }
 0x266   : > { %v1565_v18 = vpop.permute.xlu0 %1564  ;;  %v1556_v36 = vsel %vm1555_vm2, %v1549_v52, %v1554_v55  ;;  %v1297_v57 = vrot.slane %v3899_v3, %v3639_v13 }
 0x267   : > { %v1567_v30 = vrot.slane %v1565_v18, 4  ;;  %v1558_v22 = vadd.f32 %v1556_v36, %v1532_v37  ;;  %v1850_v37 = vrot.slane %v3986_v7, 4 }
 0x269   : > { %v1568_v48 = vsel %vm527_vm5, %v1566_v51, %v1567_v30  ;;  %1648 = vrot.lane.b32.xlu1 %v3729_v2, %s3150_s22  ;;  %v1852_v2 = vsel %vm884_vm10, %v1850_v37, %v3996_v42  ;;  %s2494_s22 = sshll.u32 %s3444_s17, 5 }
 0x26a   : > { %v1569_v0 = vsel %vm754_vm8, %v1568_v48, %v1565_v18  ;;  %v1856_v26 = vadd.f32 %v1852_v2, %v1830_v35  ;;  %v4067_v41 = vpop.permute.xlu0 %1328  ;;  %s390_s21 = scalar_lea.vmem [#allocation15], %s2494_s22  ;;  %s2956_s22 = sshll.u32 %s3161_s12, 4  ;;  %s2957_s22 = int_to_ptr.vmem [resolvable:$false] %s2956_s22 }
 0x26b   : > { %v1579_v47 = vmul.f32 %v1577_v40, %v1569_v0  ;;  %s2262_s16 = sshll.u32 %s390_s21, 4  ;;  %s4193_s16 = int_to_ptr.vmem [resolvable:$true] %s2262_s16 }
 0x26c   : > { %s2952_s9 = scalar_lea.vmem %s4193_s16, 512  ;;  %p2959_p13 = scmp.lt.s32.totalorder %s4193_s16, %s2957_s22 }
 0x26d   : > { %1670 = vrot.lane.b32.xlu1 %v3862_v53, %s3152_s26  ;;  %v4052_v21 = vadd.f32 %v1579_v47, %v1558_v22  ;;  %v1851_v53 = vsel %vm884_vm10, %v1850_v37, %v3986_v7  ;;  %s2532_s26 = sshll.u32 %s3232_s11, 9  ;;  %p2953_p7 = scmp.ne.s32.totalorder %s4193_s16, %s2952_s9 }
 0x26e   : > { %v1855_v4 = vadd.f32 %v1851_v53, %v1829_v49  ;;  %v1283_v63 = vpop.permute.xlu0 %1282  ;;  %s4199_s24 = scalar_lea.hbm %s4337_s6, %s2532_s26 }
 0x26f   : > { %v1286_v24 = vrot.slane %v1283_v63, 4  ;;  %p2954_p12 = pnand %p2953_p7, %p4377_p10 }
 0x271   : > { %p2955_p1 = pneg %p2954_p12 }
 0x28e   : > { %v1882_v56 = vpop.permute.xlu1 %1881 }
 0x28f   : > { %v1883_v12 = vrot.slane %v1882_v56, 4 }
 0x291   : > { %v1884_v25 = vsel %vm525_vm1, %v1883_v12, %v1882_v56  ;;  %v1888_v8 = vadd.f32 %v1883_v12, %v1856_v26  ;;  %v1590_v26 = vrot.slane %v3911_v29, %v3639_v13 }
 0x292   : > { %v1887_v31 = vadd.f32 %v1884_v25, %v1855_v4  ;;  %v1036_v4 = vrot.slane %v3954_v54, %v3639_v13 }
 0x293   : > { %v1909_v20 = vadd.f32 %v1904_v11, %v1888_v8  ;;  %v1592_v29 = vmul.f32 %v1590_v26, %v3856_v1 }
 0x294   : > { %v1908_v42 = vadd.f32 %v1905_v16, %v1887_v31 }
 0x29f   : > { %v1935_v9 = vpop.permute.xlu1 %1934 }
 0x2a0   : > { %v1936_v52 = vrot.slane %v1935_v9, 4 }
 0x2a2   : > { %v1937_v7 = vsel %vm525_vm1, %v1936_v52, %v1935_v9  ;;  %v1941_v23 = vadd.f32 %v1936_v52, %v1909_v20  ;;  %vm873_vm1 = vcmask 924672  }
 0x2a3   : > { %v1940_v46 = vadd.f32 %v1937_v7, %v1908_v42  ;;  %v1614_v7 = vrot.slane %v3944_v27, %v3639_v13 }
 0x2a4   : > { %v1956_v19 = vadd.f32 %v3675_v38, %v1941_v23  ;;  %v4081_v38 = vpop.permute.xlu0 %1351 }
 0x2a5   : > { %v1955_v50 = vadd.f32 %v3727_v60, %v1940_v46 }
 0x2a6   : > { %v1977_v61 = vadd.f32 %v1972_v45, %v1956_v19 }
 0x2a7   : > { %v1976_v62 = vadd.f32 %v1973_v58, %v1955_v50  ;;  %v1593_v58 = vadd.f32 %v1592_v29, %v4052_v21 }
 0x2a8   : > { %v2003_v33 = vadd.f32 %v1999_v39, %v1977_v61  ;;  %v880_v18 = vpop.permute.xlu0 %879 }
 0x2a9   : > { %v2002_v55 = vadd.f32 %v1998_v15, %v1976_v62  ;;  %v882_v14 = vrot.slane %v880_v18, 4 }
 0x2aa   : > { %2008 = vrot.lane.b32.xlu1 %v2003_v33, %s4376_s19 }
 0x2ab   : > { %2006 = vrot.lane.b32.xlu0 %v2002_v55, %s4376_s19 }
 0x2ac   : > { %v1020_v51 = vpop.permute.xlu0 %1019 }
 0x2ad   : > { %v1022_v49 = vrot.slane %v1020_v51, 4 }
 0x2b0   : > { %v1042_v60 = vpop.permute.xlu1 %1041  ;;  %v1602_v48 = vpop.permute.xlu0 %1601 }
 0x2b1   : > { %v1604_v8 = vrot.slane %v1602_v48, 4  ;;  %v1049_v62 = vrot.slane %v1042_v60, %v3639_v13 }
 0x2b4   : > { %v867_v17 = vpop.permute.xlu1 %866  ;;  %v889_v2 = vpop.permute.xlu0 %888 }
 0x2b5   : > { %v870_v20 = vrot.slane %v867_v17, 4  ;;  %v892_v27 = vrot.slane %v889_v2, 4 }
 0x2b8   : > { %v869_v36 = vpop.permute.xlu1 %868  ;;  %v1317_v31 = vpop.permute.xlu0 %1316 }
 0x2b9   : > { %v871_v11 = vrot.slane %v869_v36, 4 }
 0x2bb   : > { %v872_v54 = vsel %vm527_vm5, %v870_v20, %v871_v11 }
 0x2bc   : > { %v1285_v30 = vpop.permute.xlu1 %1284  ;;  %v874_v61 = vsel %vm873_vm1, %v867_v17, %v872_v54  ;;  %v1320_v17 = vrot.slane %v1317_v31, 4 }
 0x2bd   : > { %v1287_v22 = vrot.slane %v1285_v30, 4  ;;  %v876_v15 = vadd.f32 %v874_v61, %v4019_v59 }
 0x2bf   : > { %v1288_v40 = vsel %vm527_vm5, %v1286_v24, %v1287_v22 }
 0x2c0   : > { %v1289_v0 = vsel %vm602_vm3, %v1288_v40, %v1285_v30  ;;  %v4087_v47 = vpop.permute.xlu1 %1644  ;;  %vm895_vm3 = vcmask 908288   ;;  %v1346_v40 = vrot.slane %v4067_v41, %v3639_v13  ;;  %v801_v41 = vld [vmem:[#allocation10] sm:$0xf] }
 0x2c1   : > { %v1299_v28 = vmul.f32 %v1297_v57, %v1289_v0 }
 0x2c3   : > { %v4090_v56 = vadd.f32 %v1299_v28, %v4036_v44 }
 0x2c4   : > { %v878_v37 = vpop.permute.xlu1 %877 }
 0x2c5   : > { %v881_v12 = vrot.slane %v878_v37, 4 }
 0x2c7   : > { %v883_v35 = vsel %vm527_vm5, %v881_v12, %v882_v14 }
 0x2c8   : > { %v1018_v53 = vpop.permute.xlu1 %1017  ;;  %v885_v25 = vsel %vm884_vm10, %v883_v35, %v880_v18 }
 0x2c9   : > { %v1021_v3 = vrot.slane %v1018_v53, 4  ;;  %v1038_v42 = vmul.f32 %v1036_v4, %v885_v25  ;;  %v887_v33 = vadd.f32 %v885_v25, %v876_v15 }
 0x2cb   : > { %v1023_v44 = vsel %vm527_vm5, %v1021_v3, %v1022_v49  ;;  %v1369_v49 = vrot.slane %v4081_v38, %v3639_v13 }
 0x2cc   : > { %v1024_v9 = vsel %vm873_vm1, %v1018_v53, %v1023_v44  ;;  %v1600_v16 = vpop.permute.xlu1 %1599 }
 0x2cd   : > { %v1026_v52 = vadd.f32 %v1024_v9, %v4041_v10  ;;  %v1603_v45 = vrot.slane %v1600_v16, 4  ;;  %v1331_v10 = vpop.permute.xlu0 %1330  ;;  %v4132_v9 = vld [vmem:[#allocation2] sm:$0xff] }
 0x2ce   : > { %v1334_v59 = vrot.slane %v1331_v10, 4 }
 0x2cf   : > { %v1039_v23 = vadd.f32 %v1038_v42, %v1026_v52  ;;  %v1605_v43 = vsel %vm527_vm5, %v1603_v45, %v1604_v8 }
 0x2d0   : > { %v1606_v46 = vsel %vm564_vm4, %v1605_v43, %v1602_v48  ;;  %v4107_v19 = vpop.permute.xlu1 %1666  ;;  %vm1323_vm4 = vcmask 801792  }
 0x2d1   : > { %v1616_v50 = vmul.f32 %v1614_v7, %v1606_v46  ;;  %v1354_v18 = vpop.permute.xlu0 %1353 }
 0x2d2   : > { %v1357_v3 = vrot.slane %v1354_v18, 4 }
 0x2d3   : > { %v4111_v39 = vadd.f32 %v1616_v50, %v1593_v58 }
 0x2d4   : > { %v891_v1 = vpop.permute.xlu1 %890 }
 0x2d5   : > { %v893_v63 = vrot.slane %v891_v1, 4  ;;  %v1634_v37 = vpop.permute.xlu0 %1633 }
 0x2d6   : > { %v1637_v52 = vrot.slane %v1634_v37, 4 }
 0x2d7   : > { %v894_v55 = vsel %vm527_vm5, %v892_v27, %v893_v63 }
 0x2d8   : > { %v896_v36 = vsel %vm895_vm3, %v894_v55, %v891_v1  ;;  %v1319_v51 = vpop.permute.xlu1 %1318 }
 0x2d9   : > { %v898_v21 = vadd.f32 %v896_v36, %v887_v33  ;;  %v1051_v30 = vmul.f32 %v1049_v62, %v896_v36  ;;  %v1321_v24 = vrot.slane %v1319_v51, 4  ;;  %v1647_v44 = vpop.permute.xlu0 %1646 }
 0x2da   : > { %v1650_v45 = vrot.slane %v1647_v44, 4 }
 0x2db   : > { %v899_v22 = vmul.f32 0.11111111, %v898_v21  ;;  %v1052_v57 = vadd.f32 %v1051_v30, %v1039_v23  ;;  %v1322_v0 = vsel %vm527_vm5, %v1320_v17, %v1321_v24 }
 0x2dc   : > { %v1333_v60 = vpop.permute.xlu1 %1332  ;;  %v1324_v2 = vsel %vm1323_vm4, %v1317_v31, %v1322_v0 }
 0x2dd   : > { %v4118_v48 = vadd.f32 %v1052_v57, %v899_v22  ;;  %v1335_v28 = vrot.slane %v1333_v60, 4  ;;  %v1326_v4 = vadd.f32 %v1324_v2, %v4090_v56  ;;  %v1661_v56 = vrot.slane %v4087_v47, %v3639_v13  ;;  %v1669_v43 = vpop.permute.xlu0 %1668 }
 0x2de   : > { %v1672_v1 = vrot.slane %v1669_v43, 4  ;;  %v1683_v47 = vrot.slane %v4107_v19, %v3639_v13 }
 0x2df   : > { %v1336_v14 = vsel %vm527_vm5, %v1334_v59, %v1335_v28  ;;  %v1055_v12 = vcombine.high %v4118_v48, %v4118_v48 }
 0x2e0   : > { %v1338_v35 = vsel %vm1337_vm11, %v1336_v14, %v1333_v60  ;;  %v1356_v53 = vpop.permute.xlu1 %1355 }
 0x2e1   : > { %v1348_v26 = vmul.f32 %v1346_v40, %v1338_v35  ;;  %v1358_v25 = vrot.slane %v1356_v53, 4  ;;  %2498 = vmatprep.subr.msk.mxu1 %vm527_vm5, %v1055_v12 }
 0x2e2   : > { %2499 = vmatpush1.msk.msra.mxu1 %vm527_vm5, %v4118_v48 }
 0x2e3   : > { %v1359_v11 = vsel %vm527_vm5, %v1357_v3, %v1358_v25  ;;  %2500 = vmatmul.mubr.msk.f32.vlgmr.msra.gmra.mrb[0].mxu1 %vm754_vm8, %v801_v41  ;;  %v1349_v38 = vadd.f32 %v1348_v26, %v1326_v4 }
 0x2e4   : > { %v1361_v8 = vsel %vm1360_vm12, %v1359_v11, %v1356_v53  ;;  %v1636_v31 = vpop.permute.xlu1 %1635  ;;  %1758 = vmatprep.mubr.f32.mxu1 %v4132_v9 }
 0x2e5   : > { %v1371_v16 = vmul.f32 %v1369_v49, %v1361_v8  ;;  %v1638_v20 = vrot.slane %v1636_v31, 4 }
 0x2e7   : > { %v1372_v42 = vadd.f32 %v1371_v16, %v1349_v38  ;;  %v1639_v54 = vsel %vm527_vm5, %v1637_v52, %v1638_v20 }
 0x2e8   : > { %v1649_v29 = vpop.permute.xlu1 %1648  ;;  %v1640_v58 = vsel %vm1495_vm14, %v1634_v37, %v1639_v54 }
 0x2e9   : > { %v4138_v7 = vadd.f32 %v1372_v42, %v4118_v48  ;;  %v1651_v23 = vrot.slane %v1649_v29, 4  ;;  %v1642_v15 = vadd.f32 %v1640_v58, %v4111_v39 }
 0x2eb   : > { %v1652_v46 = vsel %vm527_vm5, %v1650_v45, %v1651_v23  ;;  %v1375_v50 = vcombine.high %v4138_v7, %v4138_v7 }
 0x2ec   : > { %v1653_v10 = vsel %vm1529_vm15, %v1652_v46, %v1649_v29  ;;  %v1671_v61 = vpop.permute.xlu1 %1670 }
 0x2ed   : > { %v1663_v27 = vmul.f32 %v1661_v56, %v1653_v10  ;;  %v1673_v62 = vrot.slane %v1671_v61, 4  ;;  %2503 = vmatprep.subr.msk.mxu0 %vm527_vm5, %v1375_v50 }
 0x2ee   : > { %2504 = vmatpush1.msk.msra.mxu0 %vm527_vm5, %v4138_v7 }
 0x2ef   : > { %v1674_v63 = vsel %vm527_vm5, %v1672_v1, %v1673_v62  ;;  %2505 = vmatmul.mubr.msk.f32.vlgmr.msra.gmra.mrb[2].mxu0 %vm754_vm8, %v801_v41  ;;  %v1664_v55 = vadd.f32 %v1663_v27, %v1642_v15 }
 0x2f0   : > { %v1675_v33 = vsel %vm1555_vm2, %v1674_v63, %v1671_v61  ;;  %2086 = vmatprep.mubr.f32.mxu0 %v4132_v9 }
 0x2f1   : > { %v1685_v18 = vmul.f32 %v1683_v47, %v1675_v33 }
 0x2f3   : > { %v1686_v13 = vadd.f32 %v1685_v18, %v1664_v55 }
 0x2f5   : > { %v4157_v19 = vadd.f32 %v1686_v13, %v4138_v7 }
 0x2f7   : > { %v1689_v36 = vcombine.high %v4157_v19, %v4157_v19 }
 0x2f9   : > { %2508 = vmatprep.subr.msk.mxu1 %vm527_vm5, %v1689_v36 }
 0x2fa   : > { %2509 = vmatpush1.msk.msra.mxu1 %vm527_vm5, %v4157_v19 }
 0x2fb   : > { %2510 = vmatmul.mubr.msk.f32.vlgmr.msra.gmra.mrb[2].mxu1 %vm754_vm8, %v801_v41 }
 0x2fc   : > { %2201 = vmatprep.mubr.f32.mxu1 %v4132_v9 }
 0x31c   : > { %v2009_v39 = vpop.permute.xlu1 %2008 }
 0x31d   : > { %v2011_v51 = vrot.slane %v2009_v39, 4  ;;  %v2007_v21 = vpop.permute.xlu0 %2006 }
 0x31e   : > { %v2010_v30 = vrot.slane %v2007_v21, 4 }
 0x320   : > { %v2012_v24 = vsel %vm527_vm5, %v2010_v30, %v2011_v51 }
 0x321   : > { %v2013_v17 = vsel %vm408_vm0, %v2007_v21, %v2012_v24 }
 0x322   : > { %v4169_v22 = vadd.f32 %v2013_v17, %v4157_v19 }
 0x324   : > { %v2017_v57 = vcombine.high %v4169_v22, %v4169_v22 }
 0x326   : > { %2513 = vmatprep.subr.msk.mxu0 %vm527_vm5, %v2017_v57 }
 0x327   : > { %2514 = vmatpush1.msk.msra.mxu0 %vm527_vm5, %v4169_v22 }
 0x328   : > { %2515 = vmatmul.mubr.msk.f32.vlgmr.msra.gmra.mrb[4].mxu0 %vm754_vm8, %v801_v41 }
 0x3b6   : > { %v1129_v40 = vpop.f32.mrb[0].mxu1 }
 0x3b7   : > { %v2501_v60 = vmul.f32 -1.442695, %v1129_v40  ;;  %v1131_v59 = vpop.f32.mrb[1].mxu1 }
 0x3b8   : > { %v2502_v0 = vmul.f32 -1.442695, %v1131_v59 }
 0x3b9   : > { %2748 = vpow2.f32 %v2501_v60 }
 0x3ba   : > { %2750 = vpow2.f32 %v2502_v0 }
 0x3c2   : > { %v1446_v28 = vpop.f32.mrb[2].mxu0 }
 0x3c3   : > { %v2749_v37 = vpop.eup %2748  ;;  %v2506_v14 = vmul.f32 -1.442695, %v1446_v28  ;;  %v1448_v12 = vpop.f32.mrb[3].mxu0 }
 0x3c4   : > { %v2751_v2 = vpop.eup %2750  ;;  %v1140_v35 = vadd.f32 1.0, %v2749_v37  ;;  %v2507_v53 = vmul.f32 -1.442695, %v1448_v12 }
 0x3c5   : > { %v1141_v49 = vadd.f32 1.0, %v2751_v2  ;;  %2752 = vpow2.f32 %v2506_v14 }
 0x3c6   : > { %2754 = vrcp.f32 %v1140_v35 }
 0x3c7   : > { %2756 = vrcp.f32 %v1141_v49 }
 0x3c8   : > { %2758 = vpow2.f32 %v2507_v53 }
 0x3ce   : > { %v1760_v3 = vpop.f32.mrb[2].mxu1 }
 0x3cf   : > { %v2753_v41 = vpop.eup %2752  ;;  %v2511_v26 = vmul.f32 -1.442695, %v1760_v3  ;;  %v1762_v25 = vpop.f32.mrb[3].mxu1 }
 0x3d0   : > { %v2755_v4 = vpop.eup %2754  ;;  %v1457_v11 = vadd.f32 1.0, %v2753_v41  ;;  %v2512_v44 = vmul.f32 -1.442695, %v1762_v25  ;;  %v2125_v41 = vld [vmem:[#allocation12] sm:$0xff] }
 0x3d1   : > { %v2757_v8 = vpop.eup %2756  ;;  %v1146_v31 = vadd.f32 1.0, %v2755_v4  ;;  %2760 = vpow2.f32 %v2511_v26 }
 0x3d2   : > { %v2759_v38 = vpop.eup %2758  ;;  %v1147_v16 = vadd.f32 1.0, %v2757_v8  ;;  %2762 = vrcp.f32 %v1457_v11 }
 0x3d3   : > { %v1151_v20 = vrot.slane %v1146_v31, %v3471_v6  ;;  %v1458_v52 = vadd.f32 1.0, %v2759_v38  ;;  %2764 = vpow2.f32 %v2512_v44 }
 0x3d4   : > { %v1155_v42 = vrot.slane %v1147_v16, %v3471_v6 }
 0x3d5   : > { %2766 = vrcp.f32 %v1458_v52 }
 0x3d6   : > { %v1158_v45 = vcombine.low %v1151_v20, %v1155_v42 }
 0x3d8   : > { %v1160_v29 = vmul.f32 %v1158_v45, %v4118_v48 }
 0x3da   : > { %v1162_v56 = vcombine.high %v1160_v29, %v1160_v29  ;;  %1164 = vst [vmem:[#allocation3] sm:$0xf] %v1160_v29 }
 0x3db   : > { %v2761_v54 = vpop.eup %2760 }
 0x3dc   : > { %v2763_v23 = vpop.eup %2762  ;;  %1165 = vst [vmem:[#allocation3 + $0x8] sm:$0xf] %v1162_v56  ;;  %v1771_v43 = vadd.f32 1.0, %v2761_v54 }
 0x3dd   : > { %v2765_v46 = vpop.eup %2764  ;;  %v1463_v50 = vadd.f32 1.0, %v2763_v23 }
 0x3de   : > { %2768 = vrcp.f32 %v1771_v43  ;;  %v1772_v58 = vadd.f32 1.0, %v2765_v46 }
 0x3df   : > { %v2767_v10 = vpop.eup %2766  ;;  %v1468_v61 = vrot.slane %v1463_v50, %v3554_v5 }
 0x3e0   : > { %v1464_v1 = vadd.f32 1.0, %v2767_v10  ;;  %2770 = vrcp.f32 %v1772_v58 }
 0x3e2   : > { %v1472_v6 = vrot.slane %v1464_v1, %v3554_v5 }
 0x3e4   : > { %v1475_v47 = vcombine.low %v1468_v61, %v1472_v6 }
 0x3e6   : > { %v1477_v48 = vmul.f32 %v1475_v47, %v4138_v7 }
 0x3e8   : > { %v2769_v27 = vpop.eup %2768  ;;  %v1479_v62 = vcombine.low %v1477_v48, %v1477_v48  ;;  %1482 = vst [vmem:[#allocation3 + $0x8] sm:$0xf0] %v1477_v48 }
 0x3e9   : > { %v1777_v15 = vadd.f32 1.0, %v2769_v27 }
 0x3ea   : > { %v2771_v63 = vpop.eup %2770  ;;  %1481 = vst [vmem:[#allocation3] sm:$0xf0] %v1479_v62 }
 0x3eb   : > { %v1782_v33 = vrot.slane %v1777_v15, %v3508_v32  ;;  %v1778_v55 = vadd.f32 1.0, %v2771_v63 }
 0x3ed   : > { %v1786_v18 = vrot.slane %v1778_v55, %v3508_v32 }
 0x3ef   : > { %v1789_v13 = vcombine.low %v1782_v33, %v1786_v18  ;;  %v2128_v12 = vld [vmem:[#allocation3 + $0x8] sm:$0xff] }
 0x3f1   : > { %v1791_v36 = vmul.f32 %v1789_v13, %v4157_v19  ;;  %v2127_v53 = vld [vmem:[#allocation3] sm:$0xff] }
 0x3f3   : > { %v1793_v39 = vcombine.high %v1791_v36, %v1791_v36  ;;  %1795 = vst [vmem:[#allocation3 + $0x10] sm:$0xf] %v1791_v36 }
 0x3f5   : > { %1796 = vst [vmem:[#allocation3 + $0x18] sm:$0xf] %v1793_v39 }
 0x3fb   : > { %v2088_v5 = vpop.f32.mrb[4].mxu0 }
 0x3fc   : > { %v2516_v51 = vmul.f32 -1.442695, %v2088_v5  ;;  %v2090_v7 = vpop.f32.mrb[5].mxu0 }
 0x3fd   : > { %v2517_v21 = vmul.f32 -1.442695, %v2090_v7 }
 0x3fe   : > { %2772 = vpow2.f32 %v2516_v51 }
 0x3ff   : > { %2774 = vpow2.f32 %v2517_v21 }
 0x408   : > { %v2773_v30 = vpop.eup %2772 }
 0x409   : > { %v2775_v24 = vpop.eup %2774  ;;  %v2099_v17 = vadd.f32 1.0, %v2773_v30 }
 0x40a   : > { %v2100_v57 = vadd.f32 1.0, %v2775_v24 }
 0x40b   : > { %2776 = vrcp.f32 %v2099_v17 }
 0x40c   : > { %2778 = vrcp.f32 %v2100_v57 }
 0x415   : > { %v2777_v40 = vpop.eup %2776 }
 0x416   : > { %v2779_v32 = vpop.eup %2778  ;;  %v2105_v60 = vadd.f32 1.0, %v2777_v40 }
 0x417   : > { %v2106_v59 = vadd.f32 1.0, %v2779_v32 }
 0x418   : > { %v2110_v19 = vrot.slane %v2105_v60, %v3513_v34 }
 0x419   : > { %v2114_v0 = vrot.slane %v2106_v59, %v3513_v34  ;;  %v2126_v34 = vld [vmem:[#allocation12 + $0x8] sm:$0xff] }
 0x41b   : > { %v2117_v28 = vcombine.low %v2110_v19, %v2114_v0 }
 0x41d   : > { %v2119_v37 = vmul.f32 %v2117_v28, %v4169_v22 }
 0x41f   : > { %v2121_v14 = vcombine.low %v2119_v37, %v2119_v37  ;;  %2124 = vst [vmem:[#allocation3 + $0x18] sm:$0xf0] %v2119_v37 }
 0x421   : > { %2123 = vst [vmem:[#allocation3 + $0x10] sm:$0xf0] %v2121_v14 }
 0x426   : > { %v2130_v2 = vld [vmem:[#allocation3 + $0x18] sm:$0xff] }
 0x427   : > { %v2535_v35 = vpack.c.bf16 %v2130_v2, %v2128_v12 }
 0x428   : > { %v2129_v49 = vld [vmem:[#allocation3 + $0x10] sm:$0xff] }
 0x429   : > { %2536 = vmatprep.subr.bf16.mxu1 %v2535_v35  ;;  %v2537_v3 = vpack.c.bf16 %v2129_v49, %v2127_v53 }
 0x42b   : > { %2538 = vmatpush1.bf16.msra.mxu1 %v2537_v3 }
 0x42e   : > { %2518 = vmatmul.mubr.msk.f32.vlgmr.msra.gmra.mrb[4].mxu1 %vm823_vm9, %v2125_v41 }
 0x42f   : > { %2207 = vmatprep.mubr.f32.mxu1 %v4132_v9 }
 0x432   : > { %2519 = vmatmul.mubr.msk.f32.gmra.mrb[6].mxu1 %vm823_vm9, %v2126_v34 }
 0x501   : > { %v2203_v22 = vpop.f32.mrb[4].mxu1 }
 0x502   : > { %2214 = vst [vmem:[%s390_s21] sm:$0xff] %v2203_v22  ;;  %v2226_v26 = vmul.f32 %v2203_v22, %v2203_v22  ;;  %v2205_v25 = vpop.f32.mrb[5].mxu1 }
 0x503   : > { %2215 = vst [vmem:[%s390_s21 + $0x8] sm:$0xff] %v2205_v25  ;;  %v2218_v4 = vadd.f32 %v2205_v25, %v2203_v22  ;;  %v2227_v11 = vmul.f32 %v2205_v25, %v2205_v25 }
 0x505   : > { %2219 = vadd.xlane.f32.xlu0 %v2218_v4  ;;  %v2230_v44 = vadd.f32 %v2227_v11, %v2226_v26  ;;  %v2209_v8 = vpop.f32.mrb[6].mxu1 }
 0x506   : > { %2216 = vst [vmem:[%s390_s21 + $0x10] sm:$0xff] %v2209_v8  ;;  %v2228_v31 = vmul.f32 %v2209_v8, %v2209_v8  ;;  %v2211_v9 = vpop.f32.mrb[7].mxu1 }
 0x507   : > { %2217 = vst [vmem:[%s390_s21 + $0x18] sm:$0xff] %v2211_v9  ;;  %v2221_v38 = vadd.f32 %v2211_v9, %v2209_v8  ;;  %v2229_v16 = vmul.f32 %v2211_v9, %v2211_v9  ;;  %s2958_s21 = scalar_lea.vmem %s2957_s22, 1024 }
 0x508   : > { %p2960_p0 = scmp.lt.s32.totalorder %s2958_s21, %s2952_s9 }
 0x509   : > { %2231 = vadd.xlane.f32.xlu0 %v2230_v44  ;;  %v2233_v20 = vadd.f32 %v2229_v16, %v2228_v31  ;;  %2222 = vadd.xlane.f32.xlu1 %v2221_v38 }
 0x50a   : > { %p2961_p2 = por %p2960_p0, %p2959_p13 }
 0x50c   : > { %p2962_p3 = pnand %p2961_p2, %p2955_p1 }
 0x50d   : > { %2234 = vadd.xlane.f32.xlu0 %v2233_v20 }
 0x50e   : > { %2965 = shalt.err (!%p2962_p3)
}
 0x50f   : > { %s2966_s26 = scalar_lea.hbm %s4199_s24, 512  ;;  %s2970_s12 = scalar_lea.hbm %s4337_s6, 1024 }
 0x510   : > { %p2967_p6 = scmp.ne.s32.totalorder %s4199_s24, %s2966_s26  ;;  %p2971_p8 = scmp.lt.u32.totalorder %s4199_s24, %s4337_s6 }
 0x511   : > { %p2972_p5 = scmp.lt.u32.totalorder %s2970_s12, %s2966_s26  ;;  %p2974_p7 = scmp.lt.u32.totalorder %s2966_s26, %s4199_s24 }
 0x512   : > { %p2968_p4 = pnand %p2967_p6, %p4377_p10 }
 0x513   : > { %p2973_p9 = por %p2972_p5, %p2971_p8 }
 0x514   : > { %p2969_p11 = pneg %p2968_p4 }
 0x515   : > { %p2975_p12 = por %p2974_p7, %p2973_p9 }
 0x517   : > { %p2976_p1 = pnand %p2975_p12, %p2969_p11 }
 0x519   : > { %2979 = shalt.err (!%p2976_p1)
}
 0x51a   : > { %s3162_s9 = smov 256   ;;  %s4378_s21 = smov 16  }
 0x51b   : > { %s4379_s0 = scalar_lea.sflag [#allocation6], %s3444_s17  ;;  %s397_s14 = scalar_lea.vmem [#allocation16], %s3447_s23 }
 0x51c   : > { %2561 = dma.vmem_to_hbm [thread:$0]  (%p4377_p10), %s4193_s16, 512, %s4199_s24, %s4379_s0, %s3162_s9, %s3162_s9, %s4378_s21  }
 0x51d   : > { %s2278_s15 = sshll.u32 %s397_s14, 4  ;;  %s2243_s26 = sand.u32 1, %s3232_s11   ;;  %s4229_s15 = int_to_ptr.vmem [resolvable:$true] %s2278_s15 }
 0x51e   : > { %s4354_s18 = sshll.u32 %s3232_s11, 8  ;;  %s4240_s0 = scalar_lea.vmem [#allocation18], %s3447_s23 }
 0x51f   : > { %s4237_s22 = scalar_lea.hbm %s4338_s7, %s4354_s18  ;;  %s2294_s16 = sshll.u32 %s4240_s0, 4  ;;  %s4275_s16 = int_to_ptr.vmem [resolvable:$true] %s2294_s16 }
 0x520   : > { %s4246_s24 = scalar_lea.sflag [#allocation17], %s2243_s26  ;;  %s2980_s9 = scalar_lea.vmem %s4229_s15, 256 }
 0x521   : > { %p2981_p13 = scmp.ne.s32.totalorder %s4229_s15, %s2980_s9  ;;  %s3163_s21 = smov [#allocation16]  }
 0x522   : > { %s2984_s17 = sshll.u32 %s3163_s21, 4  ;;  %s2985_s17 = int_to_ptr.vmem [resolvable:$false] %s2984_s17 }
 0x523   : > { %p2982_p0 = pnand %p2981_p13, %p4377_p10  ;;  %s2986_s23 = scalar_lea.vmem %s2985_s17, 512 }
 0x524   : > { %p2987_p3 = scmp.lt.s32.totalorder %s4229_s15, %s2985_s17  ;;  %p2988_p6 = scmp.lt.s32.totalorder %s2986_s23, %s2980_s9 }
 0x525   : > { %p2983_p2 = pneg %p2982_p0 }
 0x526   : > { %p2989_p4 = por %p2988_p6, %p2987_p3 }
 0x528   : > { %p2990_p11 = pnand %p2989_p4, %p2983_p2 }
 0x592   : > { %v2220_v52 = vpop.xlane.xlu0 %2219 }
 0x593   : > { %2224 = vst.msk [vmem:[%s397_s14] sm:$0xff] %vm682_vm6, %v2220_v52 }
 0x596   : > { %v2232_v42 = vpop.xlane.xlu0 %2231  ;;  %v2223_v45 = vpop.xlane.xlu1 %2222 }
 0x597   : > { %2236 = vst.msk [vmem:[%s4240_s0] sm:$0xff] %vm682_vm6, %v2232_v42  ;;  %2225 = vst.msk [vmem:[%s397_s14 + $0x8] sm:$0xff] %vm682_vm6, %v2223_v45 }
 0x598   : > { %2993 = shalt.err (!%p2990_p11)
}
 0x599   : > { %s2994_s14 = scalar_lea.hbm %s4237_s22, 256  ;;  %s2998_s21 = scalar_lea.hbm %s4338_s7, 512 }
 0x59a   : > { %p2995_p8 = scmp.ne.s32.totalorder %s4237_s22, %s2994_s14  ;;  %p2999_p7 = scmp.lt.u32.totalorder %s4237_s22, %s4338_s7 }
 0x59b   : > { %p3000_p12 = scmp.lt.u32.totalorder %s2998_s21, %s2994_s14  ;;  %p3002_p13 = scmp.lt.u32.totalorder %s2994_s14, %s4237_s22 }
 0x59c   : > { %p2996_p5 = pnand %p2995_p8, %p4377_p10 }
 0x59d   : > { %p3001_p1 = por %p3000_p12, %p2999_p7 }
 0x59e   : > { %p2997_p9 = pneg %p2996_p5 }
 0x59f   : > { %p3003_p0 = por %p3002_p13, %p3001_p1 }
 0x5a1   : > { %p3004_p2 = pnand %p3003_p0, %p2997_p9 }
 0x5a3   : > { %3007 = shalt.err (!%p3004_p2)
}
 0x5a4   : > { %s3164_s9 = smov 128   ;;  %s4380_s18 = sshll.u32 %s3232_s11, 8  ;;  %v2235_v29 = vpop.xlane.xlu0 %2234 }
 0x5a5   : > { %2562 = dma.vmem_to_hbm [thread:$0]  (%p4377_p10), %s4229_s15, 256, %s4237_s22, %s4246_s24, %s3164_s9, %s3164_s9, %s4376_s19  }
 0x5a6   : > { %s4282_s26 = scalar_lea.hbm %s4339_s8, %s4380_s18  ;;  %2237 = vst.msk [vmem:[%s4240_s0 + $0x8] sm:$0xff] %vm682_vm6, %v2235_v29  ;;  %s3008_s12 = scalar_lea.vmem %s4275_s16, 256 }
 0x5a7   : > { %p3009_p3 = scmp.ne.s32.totalorder %s4275_s16, %s3008_s12  ;;  %s3165_s15 = smov [#allocation18]  }
 0x5a8   : > { %s3012_s22 = sshll.u32 %s3165_s15, 4  ;;  %s3013_s22 = int_to_ptr.vmem [resolvable:$false] %s3012_s22 }
 0x5a9   : > { %p3010_p6 = pnand %p3009_p3, %p4377_p10  ;;  %s3014_s11 = scalar_lea.vmem %s3013_s22, 512 }
 0x5aa   : > { %p3015_p11 = scmp.lt.s32.totalorder %s4275_s16, %s3013_s22  ;;  %p3016_p8 = scmp.lt.s32.totalorder %s3014_s11, %s3008_s12 }
 0x5ab   : > { %p3011_p4 = pneg %p3010_p6 }
 0x5ac   : > { %p3017_p5 = por %p3016_p8, %p3015_p11 }
 0x5ae   : > { %p3018_p9 = pnand %p3017_p5, %p3011_p4 }
 0x5b0   : > { %3021 = shalt.err (!%p3018_p9)
}
 0x5b1   : > { %s3022_s0 = scalar_lea.hbm %s4282_s26, 256  ;;  %s3026_s18 = scalar_lea.hbm %s4339_s8, 512 }
 0x5b2   : > { %p3023_p7 = scmp.ne.s32.totalorder %s4282_s26, %s3022_s0  ;;  %p3027_p13 = scmp.lt.u32.totalorder %s4282_s26, %s4339_s8 }
 0x5b3   : > { %p3028_p0 = scmp.lt.u32.totalorder %s3026_s18, %s3022_s0  ;;  %p3030_p3 = scmp.lt.u32.totalorder %s3022_s0, %s4282_s26 }
 0x5b4   : > { %p3024_p12 = pnand %p3023_p7, %p4377_p10 }
 0x5b5   : > { %p3029_p2 = por %p3028_p0, %p3027_p13 }
 0x5b6   : > { %p3025_p1 = pneg %p3024_p12 }
 0x5b7   : > { %p3031_p6 = por %p3030_p3, %p3029_p2 }
 0x5b9   : > { %p3032_p4 = pnand %p3031_p6, %p3025_p1 }
 0x5bb   : > { %3035 = shalt.err (!%p3032_p4)
}
 0x5bc   : > { %2563 = dma.vmem_to_hbm [thread:$0]  (%p4377_p10), %s4275_s16, 256, %s4282_s26, %s4246_s24, %s3164_s9, %s3164_s9, %s4376_s19  }
 0x5bd PF: > { %s2309_s12 = sand.u32 1, %s3078_s27   ;;  %p4381_p11 = scmp.ne.s32.totalorder %s4362_s20, 0 }
 0x5be   : > { %p4382_p8 = scmp.ge.s32.totalorder %s3090_s30, 2  ;;  %s2310_s15 = scalar_lea.sflag [#allocation6], %s2309_s12 }
 0x5c0   : > { %p2588_p5 = pnand %p4382_p8, %p4381_p11 }
 0x5c2   : > { %3069 = dma.done.wait (!%p2588_p5), %s2310_s15, 512  }
 0x5c3   : > { %3071 = vsyncadd (!%p2588_p5), %s2310_s15, 4294966784  ;;  %s4383_s13 = sadd.s32 4294967294, %s3090_s30  }
 0x5c4   : > { %s2318_s22 = sand.u32 1, %s4383_s13  }
 0x5c5   : > { %s2319_s11 = scalar_lea.sflag [#allocation17], %s2318_s22 }
 0x5c6   : > { %3073 = dma.done.wait (!%p2588_p5), %s2319_s11, 512  }
 0x5c7   : > { %3075 = vsyncadd (!%p2588_p5), %s2319_s11, 4294966784  ;;  %p28_p10 = scmp.ge.s32.totalorder %s3372_s25, 4   ;;  %s4384_s27 = smov %s3082_s28 }
 0x5c8   : > { %s4385_s28 = smov %s3086_s29  ;;  %s4386_s29 = smov %s3384_s10 }
 0x5c9   : > { %s4387_s30 = smov %s3372_s25  ;;  %30 = sbr.rel (!%p28_p10) target bundleno = 12 (0xc), region = 141 }
 0x5d0   :  { %2333 = vsyncpa [#allocation5], 1 }
 0x5d1   :  { %2335 = vsyncpa [#allocation5 + $0x1], 1 }
 0x5d2   :  { %2336 = vsyncpa [#allocation8], 1 }
 0x5d3   :  { %2337 = vsyncpa [#allocation11], 1 }
 0x5d4   :  { %2338 = vsyncpa [#allocation14], 1 }
 0x5d5   :  { %2339 = vsyncpa [#allocation6], 1 }
 0x5d6   :  { %2341 = vsyncpa [#allocation6 + $0x1], 1 }
 0x5d7   :  { %2342 = vsyncpa [#allocation17], 1 }
 0x5d8   :  { %2344 = vsyncpa [#allocation17 + $0x1], 1 }

</bundles_post_ra>
